<compile_context>
chip_gen: v7x
topology: tpu7x:2x2x1
jax: 0.10.0
libtpu: 0.0.40
codegen_flags: <defaults>
</compile_context>

<pallas_src>
import functools

import jax
import jax.numpy as jnp
from jax.experimental import pallas as pl
from jax.experimental.pallas import tpu as pltpu


def _leaky_relu(x, negative_slope=0.2):
    return jnp.where(x > 0, x, negative_slope * x)


def _round_up(n, m):
    return ((n + m - 1) // m) * m


def _default_act_dtype():
    """bf16 elementwise on bf16-VPU chips (v6e/v7x), f32 elsewhere (v5e, ...)."""
    try:
        kind = jax.devices()[0].device_kind.lower()
    except Exception:  # pragma: no cover - defensive
        return jnp.float32
    if "v6" in kind or "v7" in kind:
        return jnp.bfloat16
    return jnp.float32


def _discriminator_kernel(x_ref, w1_ref, b1_ref, w2_ref, b2_ref, w3_ref,
                          b3_ref, o_ref, *, act_dtype):
    # x arrives in its native dtype (typically f32); the bf16 cast happens here
    # on the VPU and hides under the layer-1 MXU work instead of costing an
    # extra HBM round trip in the wrapper.
    x = x_ref[...].astype(jnp.bfloat16)

    # Layer 1: (tb,784)bf16 @ (784,512)bf16 -> f32 MXU accumulation.
    h1 = jnp.dot(x, w1_ref[...], preferred_element_type=jnp.float32)
    h1 = _leaky_relu(h1.astype(act_dtype) + b1_ref[...])

    # Layer 2: (tb,512) @ (512,256).
    h2 = jnp.dot(h1.astype(jnp.bfloat16), w2_ref[...],
                 preferred_element_type=jnp.float32)
    h2 = _leaky_relu(h2.astype(act_dtype) + b2_ref[...])

    # Layer 3: (tb,256) @ (256,1), bias, exact sigmoid (tiny tensor -> EUP
    # cost is negligible; keep it f32 for accuracy).
    h3 = jnp.dot(h2.astype(jnp.bfloat16), w3_ref[...],
                 preferred_element_type=jnp.float32)
    h3 = h3 + b3_ref[...]
    o_ref[...] = 1.0 / (1.0 + jnp.exp(-h3))


def discriminator_forward(x, params, *, tile_b=2048, act_dtype=None):
    """x: any shape flattening to (-1, 784), e.g. (B, 1, 28, 28)."""
    w1, b1, w2, b2, w3, b3 = params
    if act_dtype is None:
        act_dtype = _default_act_dtype()

    x2d = x.reshape(-1, 784)
    if x2d.dtype != jnp.bfloat16:
        x2d = x2d.astype(jnp.float32)  # fed straight in; bf16 cast is in-kernel
    B = x2d.shape[0]

    # ---- batch tiling -------------------------------------------------------
    # tile_b=2048 by default (big enough to amortize per-step overhead on all
    # chips, small enough for v7x's 64 MiB VMEM).  Cap the tile at half the
    # 16-aligned batch so there are always >= 2 grid steps when possible
    # (keeps both v7x TensorCores busy via the "parallel" grid axis).
    b16 = _round_up(B, 16)
    if b16 >= 32:
        tb = min(tile_b, _round_up(pl.cdiv(b16, 2), 16))
    else:
        tb = b16
    assert tb % 16 == 0, "batch tile must be a multiple of 16 (bf16 sublanes)"
    n_tiles = pl.cdiv(b16, tb)
    b_pad = n_tiles * tb
    if b_pad != B:
        # Only the ragged final tile needs padding; rows are independent and
        # the padded rows are sliced off below (out[:B]).
        x2d = jnp.pad(x2d, ((0, b_pad - B), (0, 0)))

    # bf16 matmul operands (f32 MXU accumulation); biases in the chip's
    # elementwise dtype.  K=784 is deliberately NOT padded to 1024.
    w1b = w1.astype(jnp.bfloat16)
    w2b = w2.astype(jnp.bfloat16)
    w3b = w3.astype(jnp.bfloat16)
    b1a = b1.reshape(1, -1).astype(act_dtype)
    b2a = b2.reshape(1, -1).astype(act_dtype)
    b3f = b3.reshape(1, -1).astype(jnp.float32)

    # Double-buffered x tiles + resident weights + intermediates fit easily in
    # 32 MiB at tile_b<=2048; raise only for larger tiles (v5e/v6e, 128 MiB).
    vmem_limit = (32 if tb <= 2048 else 64) * 1024 * 1024

    kernel = functools.partial(_discriminator_kernel, act_dtype=act_dtype)

    out = pl.pallas_call(
        kernel,
        out_shape=jax.ShapeDtypeStruct((b_pad, 1), jnp.float32),
        grid_spec=pltpu.PrefetchScalarGridSpec(
            num_scalar_prefetch=0,
            grid=(n_tiles,),
            in_specs=[
                pl.BlockSpec((tb, 784), lambda i: (i, 0)),    # x tile (pipelined)
                pl.BlockSpec((784, 512), lambda i: (0, 0)),   # w1 (resident)
                pl.BlockSpec((1, 512), lambda i: (0, 0)),     # b1
                pl.BlockSpec((512, 256), lambda i: (0, 0)),   # w2
                pl.BlockSpec((1, 256), lambda i: (0, 0)),     # b2
                pl.BlockSpec((256, 1), lambda i: (0, 0)),     # w3
                pl.BlockSpec((1, 1), lambda i: (0, 0)),       # b3
            ],
            out_specs=pl.BlockSpec((tb, 1), lambda i: (i, 0)),
        ),
        compiler_params=pltpu.CompilerParams(
            dimension_semantics=("parallel",),   # shard tiles across TCs (v7x)
            vmem_limit_bytes=vmem_limit,
        ),
    )(x2d, w1b, b1a, w2b, b2a, w3b, b3f)

    return out[:B]


def init_params(key):
    """Deterministic init matching the nn.Linear shapes of the module."""
    k1, k2, k3, k4, k5, k6 = jax.random.split(key, 6)

    def uniform(k, shape, fan_in):
        bound = 1.0 / jnp.sqrt(fan_in)
        return jax.random.uniform(k, shape, jnp.float32, -bound, bound)

    # Weights stored as (in, out); biases kept 2-D (1, out) for clean layout.
    w1 = uniform(k1, (784, 512), 784.0)
    b1 = uniform(k2, (1, 512), 784.0)
    w2 = uniform(k3, (512, 256), 512.0)
    b2 = uniform(k4, (1, 256), 512.0)
    w3 = uniform(k5, (256, 1), 256.0)
    b3 = uniform(k6, (1, 1), 256.0)
    return (w1, b1, w2, b2, w3, b3)


def reference_forward(x, params):
    """Pure-JAX f32 reference for a sanity check."""
    w1, b1, w2, b2, w3, b3 = params
    x2d = x.reshape(-1, 784).astype(jnp.float32)
    h1 = _leaky_relu(x2d @ w1 + b1)
    h2 = _leaky_relu(h1 @ w2 + b2)
    return jax.nn.sigmoid(h2 @ w3 + b3)


if __name__ == "__main__":
    key = jax.random.PRNGKey(0)
    pkey, xkey = jax.random.split(key)

    params = init_params(pkey)
    # Sign-MNIST-like input, NCHW: (batch=64, 1, 28, 28) -> flattened (64, 784).
    x = jax.random.normal(xkey, (64, 1, 28, 28), dtype=jnp.float32)

    # Small batch: the half-batch tile cap yields a 2-step grid (2 x 32 rows),
    # exercising batch tiling, resident weights, and the parallel grid axis.
    out = discriminator_forward(x, params)
    out = jax.block_until_ready(out)

    ref = reference_forward(x, params)
    assert out.shape == (64, 1), out.shape
    # bf16 matmul operands (and bf16 elementwise on v6e/v7x) vs f32 reference:
    # loose-ish atol; sigmoid itself is exact.
    assert jnp.allclose(out, ref, atol=2e-2, rtol=0.0), (
        "mismatch vs reference, max abs err = "
        f"{float(jnp.max(jnp.abs(out - ref)))}")

    print("KERNEL_OK")
</pallas_src>

<mosaic_0001>
module attributes {stable_mosaic.version = 11 : i64} {
  func.func @_discriminator_kernel(%arg0: i32, %arg1: memref<32x784xf32, #tpu.memory_space<vmem>>, %arg2: memref<784x512xbf16, #tpu.memory_space<vmem>>, %arg3: memref<1x512xf32, #tpu.memory_space<vmem>>, %arg4: memref<512x256xbf16, #tpu.memory_space<vmem>>, %arg5: memref<1x256xf32, #tpu.memory_space<vmem>>, %arg6: memref<256x1xbf16, #tpu.memory_space<vmem>>, %arg7: memref<1x1xf32, #tpu.memory_space<vmem>>, %arg8: memref<32x1xf32, #tpu.memory_space<vmem>>) attributes {dimension_semantics = [#tpu.dimension_semantics<parallel>], iteration_bounds = array<i64: 2>, scalar_prefetch = 0 : i64, scratch_operands = 0 : i64, tpu.core_type = #tpu.core_type<tc>, window_params = [{transform_indices = @transform_0, window_bounds = array<i64: 32, 784>}, {pipeline_mode = #tpu.pipeline_mode<synchronous>, transform_indices = @transform_1, window_bounds = array<i64: 784, 512>}, {pipeline_mode = #tpu.pipeline_mode<synchronous>, transform_indices = @transform_2, window_bounds = array<i64: 1, 512>}, {pipeline_mode = #tpu.pipeline_mode<synchronous>, transform_indices = @transform_3, window_bounds = array<i64: 512, 256>}, {pipeline_mode = #tpu.pipeline_mode<synchronous>, transform_indices = @transform_4, window_bounds = array<i64: 1, 256>}, {pipeline_mode = #tpu.pipeline_mode<synchronous>, transform_indices = @transform_5, window_bounds = array<i64: 256, 1>}, {pipeline_mode = #tpu.pipeline_mode<synchronous>, transform_indices = @transform_6, window_bounds = array<i64: 1, 1>}, {transform_indices = @transform_7, window_bounds = array<i64: 32, 1>}]} {
    %c0 = arith.constant 0 : index
    %c0_0 = arith.constant 0 : index
    %0 = vector.load %arg1[%c0, %c0_0] : memref<32x784xf32, #tpu.memory_space<vmem>>, vector<32x784xf32>
    %1 = arith.truncf %0 : vector<32x784xf32> to vector<32x784xbf16>
    %c0_1 = arith.constant 0 : index
    %c0_2 = arith.constant 0 : index
    %2 = vector.load %arg2[%c0_1, %c0_2] : memref<784x512xbf16, #tpu.memory_space<vmem>>, vector<784x512xbf16>
    %cst = arith.constant dense<0.000000e+00> : vector<32x512xf32>
    %3 = tpu.matmul %1, %2, %cst {dimension_numbers = #tpu.dot_dimension_numbers<[1], [0], [0], [1], [0, 0, 1, 1], [], []>} : vector<32x784xbf16>, vector<784x512xbf16>, vector<32x512xf32> -> vector<32x512xf32>
    %c0_3 = arith.constant 0 : index
    %c0_4 = arith.constant 0 : index
    %4 = vector.load %arg3[%c0_3, %c0_4] : memref<1x512xf32, #tpu.memory_space<vmem>>, vector<1x512xf32>
    %5 = vector.broadcast %4 : vector<1x512xf32> to vector<32x512xf32>
    %6 = arith.addf %3, %5 : vector<32x512xf32>
    %cst_5 = arith.constant 0.000000e+00 : f32
    %7 = vector.broadcast %cst_5 : f32 to vector<32x512xf32>
    %8 = arith.cmpf ogt, %6, %7 : vector<32x512xf32>
    %cst_6 = arith.constant 2.000000e-01 : f32
    %9 = vector.broadcast %cst_6 : f32 to vector<32x512xf32>
    %10 = arith.mulf %9, %6 : vector<32x512xf32>
    %11 = arith.select %8, %6, %10 : vector<32x512xi1>, vector<32x512xf32>
    %12 = arith.truncf %11 : vector<32x512xf32> to vector<32x512xbf16>
    %c0_7 = arith.constant 0 : index
    %c0_8 = arith.constant 0 : index
    %13 = vector.load %arg4[%c0_7, %c0_8] : memref<512x256xbf16, #tpu.memory_space<vmem>>, vector<512x256xbf16>
    %cst_9 = arith.constant dense<0.000000e+00> : vector<32x256xf32>
    %14 = tpu.matmul %12, %13, %cst_9 {dimension_numbers = #tpu.dot_dimension_numbers<[1], [0], [0], [1], [0, 0, 1, 1], [], []>} : vector<32x512xbf16>, vector<512x256xbf16>, vector<32x256xf32> -> vector<32x256xf32>
    %c0_10 = arith.constant 0 : index
    %c0_11 = arith.constant 0 : index
    %15 = vector.load %arg5[%c0_10, %c0_11] : memref<1x256xf32, #tpu.memory_space<vmem>>, vector<1x256xf32>
    %16 = vector.broadcast %15 : vector<1x256xf32> to vector<32x256xf32>
    %17 = arith.addf %14, %16 : vector<32x256xf32>
    %cst_12 = arith.constant 0.000000e+00 : f32
    %18 = vector.broadcast %cst_12 : f32 to vector<32x256xf32>
    %19 = arith.cmpf ogt, %17, %18 : vector<32x256xf32>
    %cst_13 = arith.constant 2.000000e-01 : f32
    %20 = vector.broadcast %cst_13 : f32 to vector<32x256xf32>
    %21 = arith.mulf %20, %17 : vector<32x256xf32>
    %22 = arith.select %19, %17, %21 : vector<32x256xi1>, vector<32x256xf32>
    %23 = arith.truncf %22 : vector<32x256xf32> to vector<32x256xbf16>
    %c0_14 = arith.constant 0 : index
    %c0_15 = arith.constant 0 : index
    %24 = vector.load %arg6[%c0_14, %c0_15] : memref<256x1xbf16, #tpu.memory_space<vmem>>, vector<256x1xbf16>
    %cst_16 = arith.constant dense<0.000000e+00> : vector<32x1xf32>
    %25 = tpu.matmul %23, %24, %cst_16 {dimension_numbers = #tpu.dot_dimension_numbers<[1], [0], [0], [1], [0, 0, 1, 1], [], []>} : vector<32x256xbf16>, vector<256x1xbf16>, vector<32x1xf32> -> vector<32x1xf32>
    %c0_17 = arith.constant 0 : index
    %c0_18 = arith.constant 0 : index
    %26 = vector.load %arg7[%c0_17, %c0_18] : memref<1x1xf32, #tpu.memory_space<vmem>>, vector<1x1xf32>
    %27 = vector.broadcast %26 : vector<1x1xf32> to vector<32x1xf32>
    %28 = arith.addf %25, %27 : vector<32x1xf32>
    %cst_19 = arith.constant 0.000000e+00 : f32
    %29 = vector.broadcast %cst_19 : f32 to vector<32x1xf32>
    %30 = arith.subf %29, %28 : vector<32x1xf32>
    %31 = math.exp %30 : vector<32x1xf32>
    %cst_20 = arith.constant 1.000000e+00 : f32
    %32 = vector.broadcast %cst_20 : f32 to vector<32x1xf32>
    %33 = arith.addf %32, %31 : vector<32x1xf32>
    %cst_21 = arith.constant 1.000000e+00 : f32
    %34 = vector.broadcast %cst_21 : f32 to vector<32x1xf32>
    %35 = arith.divf %34, %33 : vector<32x1xf32>
    %c0_22 = arith.constant 0 : index
    %c0_23 = arith.constant 0 : index
    %36 = vector.load %arg8[%c0_22, %c0_23] : memref<32x1xf32, #tpu.memory_space<vmem>>, vector<32x1xf32>
    tpu.vector_store %arg8[%c0_22, %c0_23], %35 {strides = array<i32>} : memref<32x1xf32, #tpu.memory_space<vmem>>, vector<32x1xf32>,
    return
  }
  func.func @transform_0(%arg0: i32) -> (i32, i32) {
    %c0_i32 = arith.constant 0 : i32
    %c0_i32_0 = arith.constant 0 : i32
    return %arg0, %c0_i32 : i32, i32
  }
  func.func @transform_1(%arg0: i32) -> (i32, i32) {
    %c0_i32 = arith.constant 0 : i32
    %c0_i32_0 = arith.constant 0 : i32
    %c0_i32_1 = arith.constant 0 : i32
    return %c0_i32, %c0_i32_0 : i32, i32
  }
  func.func @transform_2(%arg0: i32) -> (i32, i32) {
    %c0_i32 = arith.constant 0 : i32
    %c0_i32_0 = arith.constant 0 : i32
    %c0_i32_1 = arith.constant 0 : i32
    return %c0_i32, %c0_i32_0 : i32, i32
  }
  func.func @transform_3(%arg0: i32) -> (i32, i32) {
    %c0_i32 = arith.constant 0 : i32
    %c0_i32_0 = arith.constant 0 : i32
    %c0_i32_1 = arith.constant 0 : i32
    return %c0_i32, %c0_i32_0 : i32, i32
  }
  func.func @transform_4(%arg0: i32) -> (i32, i32) {
    %c0_i32 = arith.constant 0 : i32
    %c0_i32_0 = arith.constant 0 : i32
    %c0_i32_1 = arith.constant 0 : i32
    return %c0_i32, %c0_i32_0 : i32, i32
  }
  func.func @transform_5(%arg0: i32) -> (i32, i32) {
    %c0_i32 = arith.constant 0 : i32
    %c0_i32_0 = arith.constant 0 : i32
    %c0_i32_1 = arith.constant 0 : i32
    return %c0_i32, %c0_i32_0 : i32, i32
  }
  func.func @transform_6(%arg0: i32) -> (i32, i32) {
    %c0_i32 = arith.constant 0 : i32
    %c0_i32_0 = arith.constant 0 : i32
    %c0_i32_1 = arith.constant 0 : i32
    return %c0_i32, %c0_i32_0 : i32, i32
  }
  func.func @transform_7(%arg0: i32) -> (i32, i32) {
    %c0_i32 = arith.constant 0 : i32
    %c0_i32_0 = arith.constant 0 : i32
    return %arg0, %c0_i32 : i32, i32
  }
}

</mosaic_0001>

<bundles_post_ra>
// kernel: tpu_custom_call.1
= control target key start
LH: loop header
LB: loop body
LE: loop exit
PB: predicated region body
PF: predicated region fallthrough
CT: control target
= control target key end

     0   :  { %s4325_s0 = inlined_call_operand.hbm [shape: f32[64,784], index: 0, kind: input, shape index: {}]   ;;  %s4326_s1 = inlined_call_operand.hbm [shape: bf16[784,512], index: 1, kind: input, shape index: {}]   ;;  %s4327_s2 = inlined_call_operand.vmem [shape: f32[1,512], index: 2, kind: input, shape index: {}]   ;;  %s4328_s3 = inlined_call_operand.hbm [shape: bf16[512,256], index: 3, kind: input, shape index: {}]   ;;  %s4329_s4 = inlined_call_operand.vmem [shape: f32[1,256], index: 4, kind: input, shape index: {}]   ;;  %s4330_s5 = inlined_call_operand.vmem [shape: bf16[256,1], index: 5, kind: input, shape index: {}]   ;;  %s4331_s6 = inlined_call_operand.<no memory space> [shape: f32[1,1], index: 6, kind: input, shape index: {}]   ;;  %s4332_s7 = inlined_call_operand.vmem [shape: f32[64,1], index: 7, kind: output, shape index: {}]  }
   0x1   :  { %v12_v0 = vstv %s4331_s6 }
   0x2   :  { %13 = vst [vmem:[#allocation2] sm:$0x1] %v12_v0 }
   0x3   :  { %14 = vsyncpa [#allocation4], 0 }
   0x4   :  { %16 = vsyncpa [#allocation4 + $0x1], 0 }
   0x5   :  { %17 = vsyncpa [#allocation6], 0  ;;  %s3966_s26 = smov 0   ;;  %s3968_s27 = smov 0  }
   0x6   :  { %s3970_s28 = smov 0   ;;  %s3972_s29 = smov 0  }
   0x7 LB: > { %s2890_s6 = sadd.s32 4294967295, %s3911_s29   ;;  %p43_p0 = scmp.ne.s32.totalorder %s3903_s27, %s3899_s26  ;;  %s3911_s29 = sphi %s3972_s29, %s4348_s29   ;;  %s3907_s28 = sphi %s3970_s28, %s4347_s28   ;;  %s3903_s27 = sphi %s3968_s27, %s4346_s27   ;;  %s3899_s26 = sphi %s3966_s26, %s4345_s26  }
   0x8   : > { %p3988_p1 = scmp.eq.s32.totalorder %s2890_s6, 0  ;;  %p2892_p2 = scmp.ge.s32.totalorder %s3911_s29, 1 }
   0x9   : > { %p206_p3 = scmp.lt.s32.totalorder %s3911_s29, 3  ;;  %s3913_s10 = smov [#allocation5]  }
   0xa   : > { %s4337_s30 = scalar_select %p3988_p1, 1, 0 }
   0xb   : > { %p3996_p4 = por %p3988_p1, %p43_p0  ;;  %p4000_p5 = pnand %p2892_p2, %p206_p3 }
   0xc   : > { %s218_s11 = sshll.u32 %s3913_s10, 4  ;;  %s3914_s13 = smov [#allocation7]   ;;  %s219_s11 = int_to_ptr.vmem [resolvable:$true] %s218_s11 }
   0xd   : > { %s4338_s8 = scalar_select %p3996_p4, 1, 0 }
   0xe   : > { %s4339_s9 = scalar_select %p4000_p5, 1, 0 }
   0xf   : > { %p3308_p6 = pneg %p4000_p5  ;;  %s234_s14 = sshll.u32 %s3914_s13, 4  ;;  %s4012_s14 = int_to_ptr.vmem [resolvable:$true] %s234_s14 }
  0x10   : > { %s3787_s17 = scalar_lea.hbm %s4326_s1, 25088 }
  0x11   : > { %p4008_p7 = pnand %p3308_p6, %p3988_p1  ;;  %p3788_p8 = scmp.ne.s32.totalorder %s4326_s1, %s3787_s17 }
  0x12   : > { %p3794_p12 = scmp.lt.u32.totalorder %s3787_s17, %s4326_s1 }
  0x13   : > { %p3789_p9 = pneg %p4008_p7 }
  0x15   : > { %p3790_p10 = pnand %p3789_p9, %p3788_p8 }
  0x17   : > { %p3791_p11 = pneg %p3790_p10 }
  0x19   : > { %p3796_p13 = pnand %p3794_p12, %p3791_p11 }
  0x1b   : > { %3799 = shalt.err (!%p3796_p13)
}
  0x1c   : > { %s3800_s22 = scalar_lea.vmem %s219_s11, 25088  ;;  %p3808_p6 = scmp.lt.s32.totalorder %s219_s11, %s219_s11 }
  0x1d   : > { %p3801_p0 = scmp.ne.s32.totalorder %s219_s11, %s3800_s22  ;;  %p3809_p1 = scmp.lt.s32.totalorder %s3800_s22, %s3800_s22 }
  0x1f   : > { %p3803_p2 = pnand %p3801_p0, %p3789_p9  ;;  %p3810_p4 = por %p3809_p1, %p3808_p6 }
  0x21   : > { %p3804_p3 = pneg %p3803_p2 }
  0x23   : > { %p3811_p5 = pnand %p3810_p4, %p3804_p3 }
  0x25   : > { %3814 = shalt.err (!%p3811_p5)
}
  0x26   : > { %s3915_s23 = smov 256   ;;  %s3916_s24 = smov 16  }
  0x27   : > { %3311 = dma.hbm_to_vmem [thread:$0]  (!%p4008_p7), %s4326_s1, 25088, %s219_s11, [#allocation6], %s3915_s23, %s3915_s23, %s3916_s24  }
  0x28   : > { %s3815_s15 = scalar_lea.hbm %s4328_s3, 8192 }
  0x29   : > { %p3816_p8 = scmp.ne.s32.totalorder %s4328_s3, %s3815_s15  ;;  %p3822_p5 = scmp.lt.u32.totalorder %s3815_s15, %s4328_s3 }
  0x2b   : > { %p3818_p1 = pnand %p3816_p8, %p3789_p9 }
  0x2d   : > { %p3819_p4 = pneg %p3818_p1 }
  0x2f   : > { %p3824_p10 = pnand %p3822_p5, %p3819_p4 }
  0x31   : > { %3827 = shalt.err (!%p3824_p10)
}
  0x32   : > { %s3828_s11 = scalar_lea.vmem %s4012_s14, 8192  ;;  %p3836_p0 = scmp.lt.s32.totalorder %s4012_s14, %s4012_s14 }
  0x33   : > { %p3829_p11 = scmp.ne.s32.totalorder %s4012_s14, %s3828_s11  ;;  %p3837_p2 = scmp.lt.s32.totalorder %s3828_s11, %s3828_s11 }
  0x35   : > { %p3831_p12 = pnand %p3829_p11, %p3789_p9  ;;  %p3838_p3 = por %p3837_p2, %p3836_p0 }
  0x37   : > { %p3832_p13 = pneg %p3831_p12 }
  0x39   : > { %p3839_p6 = pnand %p3838_p3, %p3832_p13 }
  0x3b   : > { %3842 = shalt.err (!%p3839_p6)
}
  0x3c   : > { %s3917_s20 = smov 128   ;;  %s3918_s21 = smov 8  }
  0x3d   : > { %3314 = dma.hbm_to_vmem [thread:$0]  (!%p4008_p7), %s4328_s3, 8192, %s4012_s14, [#allocation6], %s3917_s20, %s3917_s20, %s3918_s21  }
  0x3e   : > { %s4062_s24 = sadd.s32 1, %s3911_s29   ;;  %s30_s26 = sadd.s32 1, %s3907_s28 }
  0x3f   : > { %s27_s25 = ssub.s32 %s3911_s29, %s4062_s24  ;;  %p37_p8 = scmp.ne.s32.totalorder %s3907_s28, %s3903_s27 }
  0x40   : > { %p28_p9 = scmp.eq.s32.totalorder %s27_s25, 0  ;;  %p38_p1 = scmp.eq.s32.totalorder %s3911_s29, 0 }
  0x41   : > { %p3321_p5 = scmp.lt.s32.totalorder %s3911_s29, 2  ;;  %s257_s13 = sand.u32 1, %s3907_s28  }
  0x42   : > { %s4071_s10 = scalar_select %p28_p9, %s3907_s28, %s30_s26  }
  0x43   : > { %p39_p4 = por %p38_p1, %p37_p8  ;;  %s3296_s15 = smul.u32 3584, %s3911_s29 }
  0x44   : > { %s3295_s16 = smul.u32 224, %s257_s13  ;;  %s4087_s20 = scalar_lea.sflag [#allocation4], %s257_s13 }
  0x45   : > { %s4079_s18 = scalar_lea.hbm %s4325_s0, %s3296_s15  ;;  %p4081_p7 = pnand %p3321_p5, %p39_p4 }
  0x46   : > { %s261_s19 = scalar_lea.vmem [#allocation3], %s3295_s16  ;;  %s3843_s21 = scalar_lea.hbm %s4079_s18, 3584 }
  0x47   : > { %s269_s11 = sshll.u32 %s261_s19, 4  ;;  %p3844_p10 = scmp.ne.s32.totalorder %s4079_s18, %s3843_s21  ;;  %s4085_s11 = int_to_ptr.vmem [resolvable:$true] %s269_s11 }
  0x48   : > { %p3845_p11 = pneg %p4081_p7  ;;  %s3848_s25 = scalar_lea.hbm %s4325_s0, 7168 }
  0x49   : > { %p3849_p0 = scmp.lt.u32.totalorder %s4079_s18, %s4325_s0  ;;  %p3850_p2 = scmp.lt.u32.totalorder %s3848_s25, %s3843_s21 }
  0x4a   : > { %p3846_p12 = pnand %p3845_p11, %p3844_p10  ;;  %p3852_p6 = scmp.lt.u32.totalorder %s3843_s21, %s4079_s18 }
  0x4b   : > { %p3851_p3 = por %p3850_p2, %p3849_p0 }
  0x4c   : > { %p3847_p13 = pneg %p3846_p12 }
  0x4d   : > { %p3853_p9 = por %p3852_p6, %p3851_p3 }
  0x4f   : > { %p3854_p8 = pnand %p3853_p9, %p3847_p13 }
  0x51   : > { %3857 = shalt.err (!%p3854_p8)
}
  0x52   : > { %s3858_s13 = scalar_lea.vmem %s4085_s11, 3584  ;;  %s3919_s16 = smov [#allocation3]  }
  0x53   : > { %p3859_p1 = scmp.ne.s32.totalorder %s4085_s11, %s3858_s13  ;;  %s3863_s12 = sshll.u32 %s3919_s16, 4  ;;  %s3864_s12 = int_to_ptr.vmem [resolvable:$false] %s3863_s12 }
  0x54   : > { %s3865_s17 = scalar_lea.vmem %s3864_s12, 7168  ;;  %p3866_p10 = scmp.lt.s32.totalorder %s4085_s11, %s3864_s12 }
  0x55   : > { %p3861_p4 = pnand %p3859_p1, %p3845_p11  ;;  %p3867_p12 = scmp.lt.s32.totalorder %s3865_s17, %s3858_s13 }
  0x57   : > { %p3862_p5 = pneg %p3861_p4  ;;  %p3868_p0 = por %p3867_p12, %p3866_p10 }
  0x59   : > { %p3869_p2 = pnand %p3868_p0, %p3862_p5 }
  0x5b   : > { %3872 = shalt.err (!%p3869_p2)
}
  0x5c   : > { %s3920_s19 = smov 896   ;;  %s3921_s21 = smov 56  }
  0x5d   : > { %3318 = dma.hbm_to_vmem [thread:$0]  (!%p4081_p7), %s4079_s18, 3584, %s4085_s11, %s4087_s20, %s3920_s19, %s3920_s19, %s3921_s21  }
  0x5e   : > { %p4342_p11 = scmp.ne.s32.totalorder %s4339_s9, 0 }
  0x5f   : > { %s283_s22 = sand.u32 (!%p4342_p11), 1, %s3903_s27   ;;  %p4343_p13 = scmp.ne.s32.totalorder (!%p4342_p11), %s4338_s8, 0 }
  0x60   : > { %281 = sbr.rel (%p4342_p11) target bundleno = 1068 (0x42c), region = 48  ;;  %s284_s25 = scalar_lea.sflag (!%p4342_p11), [#allocation4], %s283_s22 }
  0x61   : > { %s3297_s23 = smul.u32 (!%p4342_p11), 224, %s283_s22 }
  0x63   : > { %s4118_s26 = scalar_lea.vmem (!%p4342_p11), [#allocation3], %s3297_s23 }
  0x67   : > { %3890 = dma.done.wait (%p4343_p13), %s284_s25, 3584  }
  0x68   : > { %3892 = vsyncadd (%p4343_p13), %s284_s25, 4294963712  ;;  %p4344_p3 = scmp.ne.s32.totalorder %s4337_s30, 0 }
  0x6a   : > { %3894 = dma.done.wait (%p4344_p3), [#allocation6], 33280  }
  0x6b   : > { %3896 = vsyncadd (%p4344_p3), [#allocation6], 4294934016  ;;  %v3365_v1 = vld [vmem:[#allocation5 + $0x4] ss:$16 sps:$4 sm:$0xff]   ;;  %v3369_v3 = vld [vmem:[#allocation5] ss:$16 sps:$4 sm:$0xff]  }
  0x6c   : > { %v3367_v2 = vld [vmem:[#allocation5 + $0x204] ss:$16 sps:$4 sm:$0xff]   ;;  %1581 = vmatprep.subr.bf16.mxu1 %v3365_v1  ;;  %v3370_v4 = vld [vmem:[#allocation5 + $0x200] ss:$16 sps:$4 sm:$0xff]   ;;  %v335_v47 = vld [vmem:[%s4118_s26 + $0x8] sm:$0xff]  ;;  %vm1574_vm0 = vcmask 130048  }
  0x6d   : > { %1634 = vmatprep.subr.bf16.mxu0 %v3367_v2  ;;  %v3371_v5 = vld [vmem:[#allocation5 + $0x24] ss:$16 sps:$4 sm:$0xff]   ;;  %1582 = vmatpush1.bf16.msra.mxu1 %v3369_v3  ;;  %v3375_v7 = vld [vmem:[#allocation5 + $0x20] ss:$16 sps:$4 sm:$0xff]   ;;  %v337_v52 = vld [vmem:[%s4118_s26 + $0x18] sm:$0xff]  ;;  %s2902_s30 = sshll.u32 %s2890_s6, 2 }
  0x6e   : > { %1635 = vmatpush1.bf16.msra.mxu0 %v3370_v4  ;;  %v3373_v6 = vld [vmem:[#allocation5 + $0x224] ss:$16 sps:$4 sm:$0xff]   ;;  %1583 = vmatprep.subr.bf16.mxu1 %v3371_v5  ;;  %v3376_v8 = vld [vmem:[#allocation5 + $0x220] ss:$16 sps:$4 sm:$0xff]   ;;  %p328_p7 = scmp.lt.s32.totalorder %s2902_s30, 7 }
  0x6f   : > { %1636 = vmatprep.subr.bf16.mxu0 %v3373_v6  ;;  %v3377_v9 = vld [vmem:[#allocation5 + $0x44] ss:$16 sps:$4 sm:$0xff]   ;;  %v3381_v11 = vld [vmem:[#allocation5 + $0x40] ss:$16 sps:$4 sm:$0xff]  }
  0x70   : > { %v3379_v10 = vld [vmem:[#allocation5 + $0x244] ss:$16 sps:$4 sm:$0xff]   ;;  %v3382_v12 = vld [vmem:[#allocation5 + $0x240] ss:$16 sps:$4 sm:$0xff]   ;;  %s4350_s30 = smov (!%p328_p7, %s2902_s30), 7 }
  0x71   : > { %1584 = vmatpush1.bf16.msra.mxu1 %v3375_v7  ;;  %v3383_v13 = vld [vmem:[#allocation5 + $0x64] ss:$16 sps:$4 sm:$0xff]   ;;  %v3387_v15 = vld [vmem:[#allocation5 + $0x60] ss:$16 sps:$4 sm:$0xff]   ;;  %s2903_s8 = sshll.u32 %s4350_s30, 3 }
  0x72   : > { %1637 = vmatpush1.bf16.msra.mxu0 %v3376_v8  ;;  %1585 = vmatprep.subr.bf16.mxu1 %v3377_v9  ;;  %v3385_v14 = vld [vmem:[#allocation5 + $0x264] ss:$16 sps:$4 sm:$0xff]   ;;  %v3388_v16 = vld [vmem:[#allocation5 + $0x260] ss:$16 sps:$4 sm:$0xff]   ;;  %v341_v8 = vld [vmem:[%s4118_s26 + $0x38] sm:$0xff]  ;;  %s331_s29 = scalar_lea.vmem %s4332_s7, %s2903_s8 }
  0x73   : > { %1638 = vmatprep.subr.bf16.mxu0 %v3379_v10  ;;  %v3389_v17 = vld [vmem:[#allocation5 + $0x84] ss:$16 sps:$4 sm:$0xff]   ;;  %v3393_v19 = vld [vmem:[#allocation5 + $0x80] ss:$16 sps:$4 sm:$0xff]  }
  0x74   : > { %v3391_v18 = vld [vmem:[#allocation5 + $0x284] ss:$16 sps:$4 sm:$0xff]   ;;  %v3394_v20 = vld [vmem:[#allocation5 + $0x280] ss:$16 sps:$4 sm:$0xff]  }
  0x75   : > { %1586 = vmatpush1.bf16.msra.mxu1 %v3381_v11  ;;  %v3395_v21 = vld [vmem:[#allocation5 + $0xa4] ss:$16 sps:$4 sm:$0xff]   ;;  %v3399_v23 = vld [vmem:[#allocation5 + $0xa0] ss:$16 sps:$4 sm:$0xff]   ;;  %v343_v11 = vld [vmem:[%s4118_s26 + $0x48] sm:$0xff] }
  0x76   : > { %1639 = vmatpush1.bf16.msra.mxu0 %v3382_v12  ;;  %1587 = vmatprep.subr.bf16.mxu1 %v3383_v13  ;;  %v3397_v22 = vld [vmem:[#allocation5 + $0x2a4] ss:$16 sps:$4 sm:$0xff]   ;;  %v3400_v24 = vld [vmem:[#allocation5 + $0x2a0] ss:$16 sps:$4 sm:$0xff]   ;;  %v3466_v12 = vld [vmem:[#allocation5 + $0xc] ss:$16 sps:$4 sm:$0xff]  }
  0x77   : > { %1640 = vmatprep.subr.bf16.mxu0 %v3385_v14  ;;  %v3401_v25 = vld [vmem:[#allocation5 + $0xc4] ss:$16 sps:$4 sm:$0xff]   ;;  %v3405_v27 = vld [vmem:[#allocation5 + $0xc0] ss:$16 sps:$4 sm:$0xff]  }
  0x78   : > { %v3403_v26 = vld [vmem:[#allocation5 + $0x2c4] ss:$16 sps:$4 sm:$0xff]   ;;  %v3406_v28 = vld [vmem:[#allocation5 + $0x2c0] ss:$16 sps:$4 sm:$0xff]  }
  0x79   : > { %1588 = vmatpush1.bf16.msra.mxu1 %v3387_v15  ;;  %v3407_v29 = vld [vmem:[#allocation5 + $0xe4] ss:$16 sps:$4 sm:$0xff]   ;;  %v3411_v31 = vld [vmem:[#allocation5 + $0xe0] ss:$16 sps:$4 sm:$0xff]   ;;  %v3464_v15 = vld [vmem:[#allocation5 + $0x8] ss:$16 sps:$4 sm:$0xff]  }
  0x7a   : > { %1641 = vmatpush1.bf16.msra.mxu0 %v3388_v16  ;;  %1589 = vmatprep.subr.bf16.mxu1 %v3389_v17  ;;  %v3409_v30 = vld [vmem:[#allocation5 + $0x2e4] ss:$16 sps:$4 sm:$0xff]   ;;  %v3412_v32 = vld [vmem:[#allocation5 + $0x2e0] ss:$16 sps:$4 sm:$0xff]  }
  0x7b   : > { %1642 = vmatprep.subr.bf16.mxu0 %v3391_v18  ;;  %v3413_v33 = vld [vmem:[#allocation5 + $0x104] ss:$16 sps:$4 sm:$0xff]   ;;  %v3417_v35 = vld [vmem:[#allocation5 + $0x100] ss:$16 sps:$4 sm:$0xff]   ;;  %v3472_v18 = vld [vmem:[#allocation5 + $0x2c] ss:$16 sps:$4 sm:$0xff]  }
  0x7c   : > { %v3415_v34 = vld [vmem:[#allocation5 + $0x304] ss:$16 sps:$4 sm:$0xff]   ;;  %v3418_v36 = vld [vmem:[#allocation5 + $0x300] ss:$16 sps:$4 sm:$0xff]  }
  0x7d   : > { %1590 = vmatpush1.bf16.msra.mxu1 %v3393_v19  ;;  %v3419_v37 = vld [vmem:[#allocation5 + $0x124] ss:$16 sps:$4 sm:$0xff]   ;;  %v3423_v39 = vld [vmem:[#allocation5 + $0x120] ss:$16 sps:$4 sm:$0xff]  }
  0x7e   : > { %1643 = vmatpush1.bf16.msra.mxu0 %v3394_v20  ;;  %1591 = vmatprep.subr.bf16.mxu1 %v3395_v21  ;;  %v3421_v38 = vld [vmem:[#allocation5 + $0x324] ss:$16 sps:$4 sm:$0xff]   ;;  %v3424_v40 = vld [vmem:[#allocation5 + $0x320] ss:$16 sps:$4 sm:$0xff]   ;;  %v3470_v20 = vld [vmem:[#allocation5 + $0x28] ss:$16 sps:$4 sm:$0xff]  }
  0x7f   : > { %1644 = vmatprep.subr.bf16.mxu0 %v3397_v22  ;;  %v3425_v41 = vld [vmem:[#allocation5 + $0x144] ss:$16 sps:$4 sm:$0xff]   ;;  %v3429_v43 = vld [vmem:[#allocation5 + $0x140] ss:$16 sps:$4 sm:$0xff]   ;;  %v3478_v22 = vld [vmem:[#allocation5 + $0x4c] ss:$16 sps:$4 sm:$0xff]  }
  0x80   : > { %v3427_v42 = vld [vmem:[#allocation5 + $0x344] ss:$16 sps:$4 sm:$0xff]   ;;  %v3430_v44 = vld [vmem:[#allocation5 + $0x340] ss:$16 sps:$4 sm:$0xff]  }
  0x81   : > { %1592 = vmatpush1.bf16.msra.mxu1 %v3399_v23  ;;  %v3431_v45 = vld [vmem:[#allocation5 + $0x164] ss:$16 sps:$4 sm:$0xff]   ;;  %v3435_v48 = vld [vmem:[#allocation5 + $0x160] ss:$16 sps:$4 sm:$0xff]  }
  0x82   : > { %1645 = vmatpush1.bf16.msra.mxu0 %v3400_v24  ;;  %1593 = vmatprep.subr.bf16.mxu1 %v3401_v25  ;;  %v3433_v46 = vld [vmem:[#allocation5 + $0x364] ss:$16 sps:$4 sm:$0xff]   ;;  %v3436_v49 = vld [vmem:[#allocation5 + $0x360] ss:$16 sps:$4 sm:$0xff]   ;;  %v3476_v24 = vld [vmem:[#allocation5 + $0x48] ss:$16 sps:$4 sm:$0xff]  }
  0x83   : > { %1646 = vmatprep.subr.bf16.mxu0 %v3403_v26  ;;  %v342_v50 = vld [vmem:[%s4118_s26 + $0x40] sm:$0xff]  ;;  %v344_v53 = vld [vmem:[%s4118_s26 + $0x50] sm:$0xff]  ;;  %v3484_v26 = vld [vmem:[#allocation5 + $0x6c] ss:$16 sps:$4 sm:$0xff]  }
  0x84   : > { %v4130_v51 = vpack.c.bf16 %v342_v50, %v335_v47  ;;  %v3437_v54 = vld [vmem:[#allocation5 + $0x184] ss:$16 sps:$4 sm:$0xff]   ;;  %v4134_v56 = vpack.c.bf16 %v344_v53, %v337_v52  ;;  %v3441_v57 = vld [vmem:[#allocation5 + $0x180] ss:$16 sps:$4 sm:$0xff]   ;;  %v3500_v53 = vld [vmem:[#allocation5 + $0xc8] ss:$16 sps:$4 sm:$0xff]  }
  0x85   : > { %1594 = vmatpush1.bf16.msra.mxu1 %v3405_v27  ;;  %v3439_v55 = vld [vmem:[#allocation5 + $0x384] ss:$16 sps:$4 sm:$0xff]   ;;  %v3442_v58 = vld [vmem:[#allocation5 + $0x380] ss:$16 sps:$4 sm:$0xff]  }
  0x86   : > { %1647 = vmatpush1.bf16.msra.mxu0 %v3406_v28  ;;  %1595 = vmatprep.subr.bf16.mxu1 %v3407_v29  ;;  %v3443_v59 = vld [vmem:[#allocation5 + $0x1a4] ss:$16 sps:$4 sm:$0xff]   ;;  %v3447_v61 = vld [vmem:[#allocation5 + $0x1a0] ss:$16 sps:$4 sm:$0xff]   ;;  %v3482_v28 = vld [vmem:[#allocation5 + $0x68] ss:$16 sps:$4 sm:$0xff]  }
  0x87   : > { %1648 = vmatprep.subr.bf16.mxu0 %v3409_v30  ;;  %1613 = vmatprep.mubr.bf16.mxu1 %v4130_v51  ;;  %v3445_v60 = vld [vmem:[#allocation5 + $0x3a4] ss:$16 sps:$4 sm:$0xff]   ;;  %v3448_v62 = vld [vmem:[#allocation5 + $0x3a0] ss:$16 sps:$4 sm:$0xff]   ;;  %v3490_v30 = vld [vmem:[#allocation5 + $0x8c] ss:$16 sps:$4 sm:$0xff]  }
  0x88   : > { %1666 = vmatprep.mubr.bf16.mxu0 %v4134_v56  ;;  %v3449_v63 = vld [vmem:[#allocation5 + $0x1c4] ss:$16 sps:$4 sm:$0xff]   ;;  %v3453_v1 = vld [vmem:[#allocation5 + $0x1c0] ss:$16 sps:$4 sm:$0xff]  }
  0x89   : > { %1596 = vmatpush1.bf16.msra.mxu1 %v3411_v31  ;;  %v3451_v0 = vld [vmem:[#allocation5 + $0x3c4] ss:$16 sps:$4 sm:$0xff]   ;;  %v3454_v2 = vld [vmem:[#allocation5 + $0x3c0] ss:$16 sps:$4 sm:$0xff]  }
  0x8a   : > { %1649 = vmatpush1.bf16.msra.mxu0 %v3412_v32  ;;  %1597 = vmatprep.subr.bf16.mxu1 %v3413_v33  ;;  %v3455_v3 = vld [vmem:[#allocation5 + $0x1e4] ss:$16 sps:$4 sm:$0xff]   ;;  %v3459_v5 = vld [vmem:[#allocation5 + $0x1e0] ss:$16 sps:$4 sm:$0xff]   ;;  %v3488_v32 = vld [vmem:[#allocation5 + $0x88] ss:$16 sps:$4 sm:$0xff]  }
  0x8b   : > { %1650 = vmatprep.subr.bf16.mxu0 %v3415_v34  ;;  %v3457_v4 = vld [vmem:[#allocation5 + $0x3e4] ss:$16 sps:$4 sm:$0xff]   ;;  %v3460_v6 = vld [vmem:[#allocation5 + $0x3e0] ss:$16 sps:$4 sm:$0xff]   ;;  %v3496_v34 = vld [vmem:[#allocation5 + $0xac] ss:$16 sps:$4 sm:$0xff]  }
  0x8c   : > { %v334_v7 = vld [vmem:[%s4118_s26] sm:$0xff]  ;;  %v336_v10 = vld [vmem:[%s4118_s26 + $0x10] sm:$0xff] }
  0x8d   : > { %1598 = vmatpush1.bf16.msra.mxu1 %v3417_v35  ;;  %v3463_v9 = vld [vmem:[#allocation5 + $0x404] ss:$16 sps:$4 sm:$0xff]   ;;  %v4142_v13 = vpack.c.bf16 %v341_v8, %v334_v7  ;;  %v3461_v14 = vld [vmem:[#allocation5 + $0x400] ss:$16 sps:$4 sm:$0xff]   ;;  %v4144_v16 = vpack.c.bf16 %v343_v11, %v336_v10  ;;  %v3524_v8 = vld [vmem:[#allocation5 + $0x148] ss:$16 sps:$4 sm:$0xff]  }
  0x8e   : > { %1651 = vmatpush1.bf16.msra.mxu0 %v3418_v36  ;;  %1599 = vmatprep.subr.bf16.mxu1 %v3419_v37  ;;  %v3469_v17 = vld [vmem:[#allocation5 + $0x424] ss:$16 sps:$4 sm:$0xff]   ;;  %v3467_v19 = vld [vmem:[#allocation5 + $0x420] ss:$16 sps:$4 sm:$0xff]   ;;  %v3494_v36 = vld [vmem:[#allocation5 + $0xa8] ss:$16 sps:$4 sm:$0xff]  }
  0x8f   : > { %1652 = vmatprep.subr.bf16.mxu0 %v3421_v38  ;;  %v3475_v21 = vld [vmem:[#allocation5 + $0x444] ss:$16 sps:$4 sm:$0xff]   ;;  %v3473_v23 = vld [vmem:[#allocation5 + $0x440] ss:$16 sps:$4 sm:$0xff]   ;;  %v349_v37 = vld [vmem:[%s4118_s26 + $0x78] sm:$0xff] }
  0x90   : > { %v3481_v25 = vld [vmem:[#allocation5 + $0x464] ss:$16 sps:$4 sm:$0xff]   ;;  %v3479_v27 = vld [vmem:[#allocation5 + $0x460] ss:$16 sps:$4 sm:$0xff]   ;;  %v3532_v10 = vld [vmem:[#allocation5 + $0x16c] ss:$16 sps:$4 sm:$0xff]  }
  0x91   : > { %1600 = vmatpush1.bf16.msra.mxu1 %v3423_v39  ;;  %v3487_v29 = vld [vmem:[#allocation5 + $0x484] ss:$16 sps:$4 sm:$0xff]   ;;  %v3485_v31 = vld [vmem:[#allocation5 + $0x480] ss:$16 sps:$4 sm:$0xff]   ;;  %v3502_v39 = vld [vmem:[#allocation5 + $0xcc] ss:$16 sps:$4 sm:$0xff]  }
  0x92   : > { %1653 = vmatpush1.bf16.msra.mxu0 %v3424_v40  ;;  %1601 = vmatprep.subr.bf16.mxu1 %v3425_v41  ;;  %v3493_v33 = vld [vmem:[#allocation5 + $0x4a4] ss:$16 sps:$4 sm:$0xff]   ;;  %v3491_v35 = vld [vmem:[#allocation5 + $0x4a0] ss:$16 sps:$4 sm:$0xff]  }
  0x93   : > { %1654 = vmatprep.subr.bf16.mxu0 %v3427_v42  ;;  %v3499_v38 = vld [vmem:[#allocation5 + $0x4c4] ss:$16 sps:$4 sm:$0xff]   ;;  %v355_v42 = vld [vmem:[%s4118_s26 + $0xa8] sm:$0xff]  ;;  %v3497_v52 = vld [vmem:[#allocation5 + $0x4c0] ss:$16 sps:$4 sm:$0xff]  }
  0x94   : > { %v356_v40 = vld [vmem:[%s4118_s26 + $0xb0] sm:$0xff]  ;;  %v350_v47 = vld [vmem:[%s4118_s26 + $0x80] sm:$0xff] }
  0x95   : > { %1602 = vmatpush1.bf16.msra.mxu1 %v3429_v43  ;;  %v348_v41 = vld [vmem:[%s4118_s26 + $0x70] sm:$0xff]  ;;  %v4152_v43 = vpack.c.bf16 %v356_v40, %v349_v37 }
  0x96   : > { %1655 = vmatpush1.bf16.msra.mxu0 %v3430_v44  ;;  %1603 = vmatprep.subr.bf16.mxu1 %v3431_v45  ;;  %v4154_v44 = vpack.c.bf16 %v355_v42, %v348_v41  ;;  %v351_v45 = vld [vmem:[%s4118_s26 + $0x88] sm:$0xff]  ;;  %v3521_v7 = vld [vmem:[#allocation5 + $0x540] ss:$16 sps:$4 sm:$0xff]  }
  0x97   : > { %1656 = vmatprep.subr.bf16.mxu0 %v3433_v46  ;;  %v358_v46 = vld [vmem:[%s4118_s26 + $0xc0] sm:$0xff]  ;;  %v3560_v42 = vld [vmem:[#allocation5 + $0x228] ss:$16 sps:$4 sm:$0xff]  }
  0x98   : > { %v3527_v11 = vld [vmem:[#allocation5 + $0x560] ss:$16 sps:$4 sm:$0xff]  }
  0x99   : > { %1604 = vmatpush1.bf16.msra.mxu1 %v3435_v48  ;;  %v4159_v48 = vpack.c.bf16 %v358_v46, %v351_v45  ;;  %v3566_v41 = vld [vmem:[#allocation5 + $0x600] ss:$16 sps:$4 sm:$0xff]   ;;  %v359_v46 = vld [vmem:[%s4118_s26 + $0xc8] sm:$0xff] }
  0x9a   : > { %1657 = vmatpush1.bf16.msra.mxu0 %v3436_v49  ;;  %1605 = vmatprep.subr.bf16.mxu1 %v3437_v54  ;;  %v357_v49 = vld [vmem:[%s4118_s26 + $0xb8] sm:$0xff]  ;;  %v3505_v54 = vld [vmem:[#allocation5 + $0x4e4] ss:$16 sps:$4 sm:$0xff]  }
  0x9b   : > { %1658 = vmatprep.subr.bf16.mxu0 %v3439_v55  ;;  %v4163_v50 = vpack.c.bf16 %v357_v49, %v350_v47  ;;  %v3508_v55 = vld [vmem:[#allocation5 + $0xec] ss:$16 sps:$4 sm:$0xff]   ;;  %v352_v45 = vld [vmem:[%s4118_s26 + $0x90] sm:$0xff] }
  0x9c   : > { %v3565_v47 = vld [vmem:[#allocation5 + $0x24c] ss:$16 sps:$4 sm:$0xff]   ;;  %v4188_v49 = vpack.c.bf16 %v359_v46, %v352_v45  ;;  %v3608_v45 = vld [vmem:[#allocation5 + $0x408] ss:$16 sps:$4 sm:$0xff]  }
  0x9d   : > { %1606 = vmatpush1.bf16.msra.mxu1 %v3441_v57  ;;  %v339_v57 = vld [vmem:[%s4118_s26 + $0x28] sm:$0xff] }
  0x9e   : > { %1659 = vmatpush1.bf16.msra.mxu0 %v3442_v58  ;;  %1607 = vmatprep.subr.bf16.mxu1 %v3443_v59  ;;  %v3503_v58 = vld [vmem:[#allocation5 + $0x4e0] ss:$16 sps:$4 sm:$0xff]   ;;  %v3506_v59 = vld [vmem:[#allocation5 + $0xe8] ss:$16 sps:$4 sm:$0xff]   ;;  %v3613_v46 = vld [vmem:[#allocation5 + $0x42c] ss:$16 sps:$4 sm:$0xff]  }
  0x9f   : > { %1660 = vmatprep.subr.bf16.mxu0 %v3445_v60  ;;  %v346_v60 = vld [vmem:[%s4118_s26 + $0x60] sm:$0xff] }
  0xa1   : > { %1608 = vmatpush1.bf16.msra.mxu1 %v3447_v61  ;;  %v3511_v61 = vld [vmem:[#allocation5 + $0x504] ss:$16 sps:$4 sm:$0xff]  }
  0xa2   : > { %1661 = vmatpush1.bf16.msra.mxu0 %v3448_v62  ;;  %1609 = vmatprep.subr.bf16.mxu1 %v3449_v63  ;;  %v4171_v62 = vpack.c.bf16 %v346_v60, %v339_v57  ;;  %v3514_v63 = vld [vmem:[#allocation5 + $0x10c] ss:$16 sps:$4 sm:$0xff]  }
  0xa3   : > { %1662 = vmatprep.subr.bf16.mxu0 %v3451_v0  ;;  %v3509_v0 = vld [vmem:[#allocation5 + $0x500] ss:$16 sps:$4 sm:$0xff]   ;;  %v347_v57 = vld [vmem:[%s4118_s26 + $0x68] sm:$0xff] }
  0xa5   : > { %1610 = vmatpush1.bf16.msra.mxu1 %v3453_v1  ;;  %v3512_v1 = vld [vmem:[#allocation5 + $0x108] ss:$16 sps:$4 sm:$0xff]  }
  0xa6   : > { %1663 = vmatpush1.bf16.msra.mxu0 %v3454_v2  ;;  %1611 = vmatprep.subr.bf16.mxu1 %v3455_v3  ;;  %v3517_v2 = vld [vmem:[#allocation5 + $0x524] ss:$16 sps:$4 sm:$0xff]   ;;  %v3515_v3 = vld [vmem:[#allocation5 + $0x520] ss:$16 sps:$4 sm:$0xff]  }
  0xa7   : > { %1664 = vmatprep.subr.bf16.mxu0 %v3457_v4  ;;  %v3518_v4 = vld [vmem:[#allocation5 + $0x128] ss:$16 sps:$4 sm:$0xff]  }
  0xa9   : > { %1612 = vmatpush1.bf16.msra.mxu1 %v3459_v5  ;;  %v3523_v5 = vld [vmem:[#allocation5 + $0x544] ss:$16 sps:$4 sm:$0xff]  }
  0xaa   : > { %1665 = vmatpush1.bf16.msra.mxu0 %v3460_v6  ;;  %1793 = vmatprep.subr.bf16.mxu1 %v3466_v12  ;;  %v3526_v6 = vld [vmem:[#allocation5 + $0x14c] ss:$16 sps:$4 sm:$0xff]   ;;  %v3530_v12 = vld [vmem:[#allocation5 + $0x168] ss:$16 sps:$4 sm:$0xff]  }
  0xab   : > { %1687 = vmatprep.subr.bf16.mxu0 %v3463_v9  ;;  %v3529_v9 = vld [vmem:[#allocation5 + $0x564] ss:$16 sps:$4 sm:$0xff]  }
  0xac   : > { %1614 = vmatmul.mubr.bf16.vlgmr.msra.gmra.mrb[0].mxu1 %v4142_v13 }
  0xad   : > { %1667 = vmatmul.mubr.bf16.vlgmr.msra.gmra.mrb[0].mxu0 %v4144_v16  ;;  %1794 = vmatpush1.bf16.msra.mxu1 %v3464_v15  ;;  %v3538_v15 = vld [vmem:[#allocation5 + $0x18c] ss:$16 sps:$4 sm:$0xff]  }
  0xae   : > { %1688 = vmatpush1.bf16.msra.mxu0 %v3461_v14  ;;  %1795 = vmatprep.subr.bf16.mxu1 %v3472_v18  ;;  %v3535_v14 = vld [vmem:[#allocation5 + $0x584] ss:$16 sps:$4 sm:$0xff]   ;;  %v3536_v18 = vld [vmem:[#allocation5 + $0x188] ss:$16 sps:$4 sm:$0xff]  }
  0xaf   : > { %1689 = vmatprep.subr.bf16.mxu0 %v3469_v17  ;;  %1623 = vmatprep.mubr.bf16.mxu1 %v4152_v43  ;;  %v3533_v17 = vld [vmem:[#allocation5 + $0x580] ss:$16 sps:$4 sm:$0xff]  }
  0xb0   : > { %1676 = vmatprep.mubr.bf16.mxu0 %v4159_v48 }
  0xb1   : > { %1796 = vmatpush1.bf16.msra.mxu1 %v3470_v20  ;;  %v3544_v20 = vld [vmem:[#allocation5 + $0x1ac] ss:$16 sps:$4 sm:$0xff]  }
  0xb2   : > { %1690 = vmatpush1.bf16.msra.mxu0 %v3467_v19  ;;  %1797 = vmatprep.subr.bf16.mxu1 %v3478_v22  ;;  %v3541_v19 = vld [vmem:[#allocation5 + $0x5a4] ss:$16 sps:$4 sm:$0xff]   ;;  %v3542_v22 = vld [vmem:[#allocation5 + $0x1a8] ss:$16 sps:$4 sm:$0xff]  }
  0xb3   : > { %1691 = vmatprep.subr.bf16.mxu0 %v3475_v21  ;;  %v3539_v21 = vld [vmem:[#allocation5 + $0x5a0] ss:$16 sps:$4 sm:$0xff]  }
  0xb4   : > { %1624 = vmatmul.mubr.bf16.gmra.mrb[4].mxu1 %v4154_v44 }
  0xb5   : > { %1798 = vmatpush1.bf16.msra.mxu1 %v3476_v24  ;;  %1677 = vmatmul.mubr.bf16.gmra.mrb[4].mxu0 %v4163_v50  ;;  %v3550_v24 = vld [vmem:[#allocation5 + $0x1cc] ss:$16 sps:$4 sm:$0xff]  }
  0xb6   : > { %1692 = vmatpush1.bf16.msra.mxu0 %v3473_v23  ;;  %1799 = vmatprep.subr.bf16.mxu1 %v3484_v26  ;;  %v3547_v23 = vld [vmem:[#allocation5 + $0x5c4] ss:$16 sps:$4 sm:$0xff]   ;;  %v3548_v26 = vld [vmem:[#allocation5 + $0x1c8] ss:$16 sps:$4 sm:$0xff]  }
  0xb7   : > { %1693 = vmatprep.subr.bf16.mxu0 %v3481_v25  ;;  %1825 = vmatprep.mubr.bf16.mxu1 %v4130_v51  ;;  %v3520_v51 = vld [vmem:[#allocation5 + $0x12c] ss:$16 sps:$4 sm:$0xff]   ;;  %v3545_v25 = vld [vmem:[#allocation5 + $0x5c0] ss:$16 sps:$4 sm:$0xff]  }
  0xb8   : > { %1719 = vmatprep.mubr.bf16.mxu0 %v4171_v62 }
  0xb9   : > { %1800 = vmatpush1.bf16.msra.mxu1 %v3482_v28  ;;  %v3556_v28 = vld [vmem:[#allocation5 + $0x1ec] ss:$16 sps:$4 sm:$0xff]  }
  0xba   : > { %1694 = vmatpush1.bf16.msra.mxu0 %v3479_v27  ;;  %1801 = vmatprep.subr.bf16.mxu1 %v3490_v30  ;;  %v3553_v27 = vld [vmem:[#allocation5 + $0x5e4] ss:$16 sps:$4 sm:$0xff]   ;;  %v3554_v30 = vld [vmem:[#allocation5 + $0x1e8] ss:$16 sps:$4 sm:$0xff]  }
  0xbb   : > { %1695 = vmatprep.subr.bf16.mxu0 %v3487_v29  ;;  %v3551_v29 = vld [vmem:[#allocation5 + $0x5e0] ss:$16 sps:$4 sm:$0xff]  }
  0xbd   : > { %1802 = vmatpush1.bf16.msra.mxu1 %v3488_v32  ;;  %v345_v32 = vld [vmem:[%s4118_s26 + $0x58] sm:$0xff] }
  0xbe   : > { %1696 = vmatpush1.bf16.msra.mxu0 %v3485_v31  ;;  %1803 = vmatprep.subr.bf16.mxu1 %v3496_v34  ;;  %v338_v31 = vld [vmem:[%s4118_s26 + $0x20] sm:$0xff]  ;;  %v353_v34 = vld [vmem:[%s4118_s26 + $0x98] sm:$0xff] }
  0xbf   : > { %1697 = vmatprep.subr.bf16.mxu0 %v3493_v33  ;;  %v3559_v33 = vld [vmem:[#allocation5 + $0x20c] ss:$16 sps:$4 sm:$0xff]   ;;  %v4178_v37 = vpack.c.bf16 %v345_v32, %v338_v31  ;;  %v3674_v31 = vld [vmem:[#allocation7 + $0x50] ss:$8 sps:$4 sm:$0xff]  }
  0xc0   : > { %v3679_v32 = vld [vmem:[#allocation7 + $0x64] ss:$8 sps:$4 sm:$0xff]  }
  0xc1   : > { %1804 = vmatpush1.bf16.msra.mxu1 %v3494_v36  ;;  %v3568_v36 = vld [vmem:[#allocation5 + $0x604] ss:$16 sps:$4 sm:$0xff]  }
  0xc2   : > { %1698 = vmatpush1.bf16.msra.mxu0 %v3491_v35  ;;  %1805 = vmatprep.subr.bf16.mxu1 %v3502_v39  ;;  %v360_v35 = vld [vmem:[%s4118_s26 + $0xd0] sm:$0xff]  ;;  %v3562_v39 = vld [vmem:[#allocation5 + $0x22c] ss:$16 sps:$4 sm:$0xff]  }
  0xc3   : > { %1699 = vmatprep.subr.bf16.mxu0 %v3499_v38  ;;  %v3557_v38 = vld [vmem:[#allocation5 + $0x208] ss:$16 sps:$4 sm:$0xff]   ;;  %v4180_v40 = vpack.c.bf16 %v360_v35, %v353_v34  ;;  %v3607_v34 = vld [vmem:[#allocation5 + $0x3ec] ss:$16 sps:$4 sm:$0xff]  }
  0xc4   : > { %v3677_v35 = vld [vmem:[#allocation7 + $0x60] ss:$8 sps:$4 sm:$0xff]  }
  0xc5   : > { %1806 = vmatpush1.bf16.msra.mxu1 %v3500_v53  ;;  %v3563_v53 = vld [vmem:[#allocation5 + $0x248] ss:$16 sps:$4 sm:$0xff]  }
  0xc6   : > { %1700 = vmatpush1.bf16.msra.mxu0 %v3497_v52  ;;  %1807 = vmatprep.subr.bf16.mxu1 %v3508_v55  ;;  %v3649_v52 = vld [vmem:[#allocation5 + $0x60c] ss:$16 sps:$4 sm:$0xff]   ;;  %v340_v55 = vld [vmem:[%s4118_s26 + $0x30] sm:$0xff] }
  0xc7   : > { %1701 = vmatprep.subr.bf16.mxu0 %v3505_v54  ;;  %v3569_v54 = vld [vmem:[#allocation5 + $0x268] ss:$16 sps:$4 sm:$0xff]   ;;  %v368_v60 = vpack.c.bf16 %v347_v57, %v340_v55  ;;  %v3691_v55 = vld [vmem:[#allocation7 + $0xa4] ss:$8 sps:$4 sm:$0xff]  }
  0xc8   : > { %v3614_v57 = vld [vmem:[#allocation5 + $0x448] ss:$16 sps:$4 sm:$0xff]  }
  0xc9   : > { %1808 = vmatpush1.bf16.msra.mxu1 %v3506_v59  ;;  %v3572_v59 = vld [vmem:[#allocation5 + $0x288] ss:$16 sps:$4 sm:$0xff]  }
  0xca   : > { %1702 = vmatpush1.bf16.msra.mxu0 %v3503_v58  ;;  %1809 = vmatprep.subr.bf16.mxu1 %v3514_v63  ;;  %v3922_v58 = vmov 0   ;;  %v3647_v63 = vld [vmem:[#allocation5 + $0x608] ss:$16 sps:$4 sm:$0xff]  }
  0xcb   : > { %1703 = vmatprep.subr.bf16.mxu0 %v3511_v61  ;;  %v3577_v61 = vld [vmem:[#allocation5 + $0x2ac] ss:$16 sps:$4 sm:$0xff]  }
  0xcd   : > { %1810 = vmatpush1.bf16.msra.mxu1 %v3512_v1  ;;  %v354_v1 = vld [vmem:[%s4118_s26 + $0xa0] sm:$0xff] }
  0xce   : > { %1704 = vmatpush1.bf16.msra.mxu0 %v3509_v0  ;;  %1811 = vmatprep.subr.bf16.mxu1 %v3520_v51  ;;  %v3575_v0 = vld [vmem:[#allocation5 + $0x2a8] ss:$16 sps:$4 sm:$0xff]  }
  0xcf   : > { %1705 = vmatprep.subr.bf16.mxu0 %v3517_v2  ;;  %v361_v2 = vld [vmem:[%s4118_s26 + $0xd8] sm:$0xff] }
  0xd0   : > { %v3578_v51 = vld [vmem:[#allocation5 + $0x2c8] ss:$16 sps:$4 sm:$0xff]  }
  0xd1   : > { %1812 = vmatpush1.bf16.msra.mxu1 %v3518_v4  ;;  %v3661_v4 = vld [vmem:[#allocation7 + $0x4] ss:$8 sps:$4 sm:$0xff]  }
  0xd2   : > { %1706 = vmatpush1.bf16.msra.mxu0 %v3515_v3  ;;  %1813 = vmatprep.subr.bf16.mxu1 %v3526_v6  ;;  %v375_v3 = vpack.c.bf16 %v361_v2, %v354_v1  ;;  %v3586_v6 = vld [vmem:[#allocation5 + $0x30c] ss:$16 sps:$4 sm:$0xff]   ;;  %v3695_v1 = vld [vmem:[#allocation7 + $0xc0] ss:$8 sps:$4 sm:$0xff]  }
  0xd3   : > { %1707 = vmatprep.subr.bf16.mxu0 %v3523_v5  ;;  %v3581_v5 = vld [vmem:[#allocation5 + $0x2e8] ss:$16 sps:$4 sm:$0xff]  }
  0xd4   : > { %v3623_v2 = vld [vmem:[#allocation5 + $0x4a8] ss:$16 sps:$4 sm:$0xff]  }
  0xd5   : > { %1814 = vmatpush1.bf16.msra.mxu1 %v3524_v8  ;;  %v3589_v8 = vld [vmem:[#allocation5 + $0x32c] ss:$16 sps:$4 sm:$0xff]  }
  0xd6   : > { %1708 = vmatpush1.bf16.msra.mxu0 %v3521_v7  ;;  %1815 = vmatprep.subr.bf16.mxu1 %v3532_v10  ;;  %v3584_v7 = vld [vmem:[#allocation5 + $0x308] ss:$16 sps:$4 sm:$0xff]   ;;  %v3664_v10 = vld [vmem:[#allocation7 + $0x14] ss:$8 sps:$4 sm:$0xff]  }
  0xd7   : > { %1709 = vmatprep.subr.bf16.mxu0 %v3529_v9  ;;  %v3659_v9 = vld [vmem:[#allocation7] ss:$8 sps:$4 sm:$0xff]  }
  0xd9   : > { %1816 = vmatpush1.bf16.msra.mxu1 %v3530_v12  ;;  %v3592_v12 = vld [vmem:[#allocation5 + $0x34c] ss:$16 sps:$4 sm:$0xff]  }
  0xda   : > { %1710 = vmatpush1.bf16.msra.mxu0 %v3527_v11  ;;  %1817 = vmatprep.subr.bf16.mxu1 %v3538_v15  ;;  %v3587_v11 = vld [vmem:[#allocation5 + $0x328] ss:$16 sps:$4 sm:$0xff]   ;;  %v3667_v15 = vld [vmem:[#allocation7 + $0x24] ss:$8 sps:$4 sm:$0xff]  }
  0xdb   : > { %1711 = vmatprep.subr.bf16.mxu0 %v3535_v14  ;;  %v3662_v14 = vld [vmem:[#allocation7 + $0x10] ss:$8 sps:$4 sm:$0xff]  }
  0xdd   : > { %1818 = vmatpush1.bf16.msra.mxu1 %v3536_v18  ;;  %v3595_v18 = vld [vmem:[#allocation5 + $0x36c] ss:$16 sps:$4 sm:$0xff]  }
  0xde   : > { %1712 = vmatpush1.bf16.msra.mxu0 %v3533_v17  ;;  %1819 = vmatprep.subr.bf16.mxu1 %v3544_v20  ;;  %v3590_v17 = vld [vmem:[#allocation5 + $0x348] ss:$16 sps:$4 sm:$0xff]   ;;  %v3670_v20 = vld [vmem:[#allocation7 + $0x34] ss:$8 sps:$4 sm:$0xff]  }
  0xdf   : > { %1713 = vmatprep.subr.bf16.mxu0 %v3541_v19  ;;  %v3665_v19 = vld [vmem:[#allocation7 + $0x20] ss:$8 sps:$4 sm:$0xff]  }
  0xe1   : > { %1820 = vmatpush1.bf16.msra.mxu1 %v3542_v22  ;;  %v3598_v22 = vld [vmem:[#allocation5 + $0x38c] ss:$16 sps:$4 sm:$0xff]  }
  0xe2   : > { %1714 = vmatpush1.bf16.msra.mxu0 %v3539_v21  ;;  %1821 = vmatprep.subr.bf16.mxu1 %v3550_v24  ;;  %v3593_v21 = vld [vmem:[#allocation5 + $0x368] ss:$16 sps:$4 sm:$0xff]   ;;  %v3673_v24 = vld [vmem:[#allocation7 + $0x44] ss:$8 sps:$4 sm:$0xff]  }
  0xe3   : > { %1715 = vmatprep.subr.bf16.mxu0 %v3547_v23  ;;  %v3668_v23 = vld [vmem:[#allocation7 + $0x30] ss:$8 sps:$4 sm:$0xff]  }
  0xe5   : > { %1822 = vmatpush1.bf16.msra.mxu1 %v3548_v26  ;;  %v3601_v26 = vld [vmem:[#allocation5 + $0x3ac] ss:$16 sps:$4 sm:$0xff]  }
  0xe6   : > { %1716 = vmatpush1.bf16.msra.mxu0 %v3545_v25  ;;  %1823 = vmatprep.subr.bf16.mxu1 %v3556_v28  ;;  %v3596_v25 = vld [vmem:[#allocation5 + $0x388] ss:$16 sps:$4 sm:$0xff]   ;;  %v3676_v28 = vld [vmem:[#allocation7 + $0x54] ss:$8 sps:$4 sm:$0xff]  }
  0xe7   : > { %1717 = vmatprep.subr.bf16.mxu0 %v3553_v27  ;;  %v3671_v27 = vld [vmem:[#allocation7 + $0x40] ss:$8 sps:$4 sm:$0xff]  }
  0xe9   : > { %1824 = vmatpush1.bf16.msra.mxu1 %v3554_v30  ;;  %v3604_v30 = vld [vmem:[#allocation5 + $0x3cc] ss:$16 sps:$4 sm:$0xff]  }
  0xea   : > { %1718 = vmatpush1.bf16.msra.mxu0 %v3551_v29  ;;  %1846 = vmatprep.subr.bf16.mxu1 %v3559_v33  ;;  %v3599_v29 = vld [vmem:[#allocation5 + $0x3a8] ss:$16 sps:$4 sm:$0xff]  }
  0xeb   : > { %1740 = vmatprep.subr.bf16.mxu0 %v3568_v36  ;;  %v3602_v33 = vld [vmem:[#allocation5 + $0x3c8] ss:$16 sps:$4 sm:$0xff]   ;;  %v3682_v36 = vld [vmem:[#allocation7 + $0x74] ss:$8 sps:$4 sm:$0xff]  }
  0xec   : > { %1826 = vmatmul.mubr.bf16.vlgmr.msra.gmra.mrb[8].mxu1 %v4142_v13  ;;  %v3571_v13 = vld [vmem:[#allocation5 + $0x26c] ss:$16 sps:$4 sm:$0xff]  }
  0xed   : > { %1720 = vmatmul.mubr.bf16.vlgmr.msra.gmra.mrb[0].mxu0 %v4178_v37  ;;  %1847 = vmatpush1.bf16.msra.mxu1 %v3557_v38  ;;  %v3605_v38 = vld [vmem:[#allocation5 + $0x3e8] ss:$16 sps:$4 sm:$0xff]  }
  0xee   : > { %1729 = vmatprep.mubr.bf16.mxu0 %v4180_v40  ;;  %1848 = vmatprep.subr.bf16.mxu1 %v3562_v39  ;;  %v3610_v39 = vld [vmem:[#allocation5 + $0x40c] ss:$16 sps:$4 sm:$0xff]  }
  0xef   : > { %1741 = vmatpush1.bf16.msra.mxu0 %v3566_v41  ;;  %1835 = vmatprep.mubr.bf16.mxu1 %v4152_v43  ;;  %v3574_v43 = vld [vmem:[#allocation5 + $0x28c] ss:$16 sps:$4 sm:$0xff]   ;;  %v3680_v41 = vld [vmem:[#allocation7 + $0x70] ss:$8 sps:$4 sm:$0xff]  }
  0xf0   : > { %1952 = vmatprep.subr.bf16.mxu0 %v3649_v52  ;;  %v3688_v52 = vld [vmem:[#allocation7 + $0x94] ss:$8 sps:$4 sm:$0xff]  }
  0xf1   : > { %1849 = vmatpush1.bf16.msra.mxu1 %v3560_v42  ;;  %v3685_v42 = vld [vmem:[#allocation7 + $0x84] ss:$8 sps:$4 sm:$0xff]  }
  0xf2   : > { %1850 = vmatprep.subr.bf16.mxu1 %v3565_v47  ;;  %v3683_v47 = vld [vmem:[#allocation7 + $0x80] ss:$8 sps:$4 sm:$0xff]  }
  0xf4   : > { %1836 = vmatmul.mubr.bf16.gmra.mrb[12].mxu1 %v4154_v44  ;;  %v3580_v44 = vld [vmem:[#allocation5 + $0x2cc] ss:$16 sps:$4 sm:$0xff]  }
  0xf5   : > { %1730 = vmatmul.mubr.bf16.gmra.mrb[4].mxu0 %v4188_v49  ;;  %1851 = vmatpush1.bf16.msra.mxu1 %v3563_v53  ;;  %v3611_v53 = vld [vmem:[#allocation5 + $0x428] ss:$16 sps:$4 sm:$0xff]  }
  0xf6   : > { %1772 = vmatprep.mubr.bf16.mxu0 %v3922_v58  ;;  %1852 = vmatprep.subr.bf16.mxu1 %v3571_v13  ;;  %v3616_v13 = vld [vmem:[#allocation5 + $0x44c] ss:$16 sps:$4 sm:$0xff]  }
  0xf7   : > { %1878 = vmatprep.mubr.bf16.mxu1 %v4134_v56  ;;  %v3583_v56 = vld [vmem:[#allocation5 + $0x2ec] ss:$16 sps:$4 sm:$0xff]  }
  0xf9   : > { %1853 = vmatpush1.bf16.msra.mxu1 %v3569_v54  ;;  %v3686_v54 = vld [vmem:[#allocation7 + $0x90] ss:$8 sps:$4 sm:$0xff]  }
  0xfa   : > { %1854 = vmatprep.subr.bf16.mxu1 %v3574_v43  ;;  %v3689_v43 = vld [vmem:[#allocation7 + $0xa0] ss:$8 sps:$4 sm:$0xff]  }
  0xfd   : > { %3100 = vmatmul.mubr.msk.bf16.vlgmr.msra.gmra.mrb[0].mxu0 %vm1574_vm0, %v368_v60  ;;  %1855 = vmatpush1.bf16.msra.mxu1 %v3572_v59  ;;  %v3694_v59 = vld [vmem:[#allocation7 + $0xb4] ss:$8 sps:$4 sm:$0xff]  }
  0xfe   : > { %1782 = vmatprep.mubr.bf16.mxu0 %v3922_v58  ;;  %1856 = vmatprep.subr.bf16.mxu1 %v3577_v61  ;;  %v3697_v61 = vld [vmem:[#allocation7 + $0xc4] ss:$8 sps:$4 sm:$0xff]  }
  0xff   : > { %1953 = vmatpush1.bf16.msra.mxu0 %v3647_v63  ;;  %v3620_v63 = vld [vmem:[#allocation5 + $0x488] ss:$16 sps:$4 sm:$0xff]  }
 0x100   : > { %2457 = vmatprep.subr.bf16.mxu0 %v3661_v4  ;;  %v3637_v4 = vld [vmem:[#allocation5 + $0x52c] ss:$16 sps:$4 sm:$0xff]  }
 0x101   : > { %1857 = vmatpush1.bf16.msra.mxu1 %v3575_v0  ;;  %v3625_v0 = vld [vmem:[#allocation5 + $0x4ac] ss:$16 sps:$4 sm:$0xff]  }
 0x102   : > { %1858 = vmatprep.subr.bf16.mxu1 %v3580_v44  ;;  %v3631_v44 = vld [vmem:[#allocation5 + $0x4ec] ss:$16 sps:$4 sm:$0xff]  }
 0x105   : > { %3101 = vmatmul.mubr.msk.bf16.gmra.mrb[4].mxu0 %vm1574_vm0, %v375_v3  ;;  %1859 = vmatpush1.bf16.msra.mxu1 %v3578_v51  ;;  %v3629_v51 = vld [vmem:[#allocation5 + $0x4e8] ss:$16 sps:$4 sm:$0xff]  }
 0x106   : > { %1984 = vmatprep.mubr.bf16.mxu0 %v3922_v58  ;;  %1860 = vmatprep.subr.bf16.mxu1 %v3583_v56  ;;  %v3632_v56 = vld [vmem:[#allocation5 + $0x508] ss:$16 sps:$4 sm:$0xff]  }
 0x109   : > { %1861 = vmatpush1.bf16.msra.mxu1 %v3581_v5  ;;  %v3635_v5 = vld [vmem:[#allocation5 + $0x528] ss:$16 sps:$4 sm:$0xff]  }
 0x10a   : > { %1862 = vmatprep.subr.bf16.mxu1 %v3586_v6  ;;  %v3700_v6 = vld [vmem:[#allocation7 + $0xd4] ss:$8 sps:$4 sm:$0xff]  }
 0x10d   : > { %3102 = vmatmul.mubr.msk.bf16.vlgmr.msra.gmra.mrb[8].mxu0 %vm1574_vm0, %v368_v60  ;;  %1863 = vmatpush1.bf16.msra.mxu1 %v3584_v7  ;;  %v3692_v60 = vld [vmem:[#allocation7 + $0xb0] ss:$8 sps:$4 sm:$0xff]   ;;  %v3640_v7 = vld [vmem:[#allocation5 + $0x54c] ss:$16 sps:$4 sm:$0xff]  }
 0x10e   : > { %1994 = vmatprep.mubr.bf16.mxu0 %v3922_v58  ;;  %1864 = vmatprep.subr.bf16.mxu1 %v3589_v8  ;;  %v3619_v58 = vld [vmem:[#allocation5 + $0x46c] ss:$16 sps:$4 sm:$0xff]   ;;  %v3698_v8 = vld [vmem:[#allocation7 + $0xd0] ss:$8 sps:$4 sm:$0xff]  }
 0x10f   : > { %2458 = vmatpush1.bf16.msra.mxu0 %v3659_v9  ;;  %v3638_v9 = vld [vmem:[#allocation5 + $0x548] ss:$16 sps:$4 sm:$0xff]  }
 0x110   : > { %2459 = vmatprep.subr.bf16.mxu0 %v3664_v10  ;;  %v3703_v10 = vld [vmem:[#allocation7 + $0xe4] ss:$8 sps:$4 sm:$0xff]  }
 0x111   : > { %1865 = vmatpush1.bf16.msra.mxu1 %v3587_v11  ;;  %v3643_v11 = vld [vmem:[#allocation5 + $0x56c] ss:$16 sps:$4 sm:$0xff]  }
 0x112   : > { %1866 = vmatprep.subr.bf16.mxu1 %v3592_v12  ;;  %v3701_v12 = vld [vmem:[#allocation7 + $0xe0] ss:$8 sps:$4 sm:$0xff]  }
 0x113   : > { %2460 = vmatpush1.bf16.msra.mxu0 %v3662_v14  ;;  %v3641_v14 = vld [vmem:[#allocation5 + $0x568] ss:$16 sps:$4 sm:$0xff]  }
 0x114   : > { %2461 = vmatprep.subr.bf16.mxu0 %v3667_v15  ;;  %v3706_v15 = vld [vmem:[#allocation7 + $0xf4] ss:$8 sps:$4 sm:$0xff]  }
 0x115   : > { %3103 = vmatmul.mubr.msk.bf16.gmra.mrb[12].mxu0 %vm1574_vm0, %v375_v3  ;;  %1867 = vmatpush1.bf16.msra.mxu1 %v3590_v17  ;;  %v3634_v3 = vld [vmem:[#allocation5 + $0x50c] ss:$16 sps:$4 sm:$0xff]  }
 0x116   : > { %1868 = vmatprep.subr.bf16.mxu1 %v3595_v18  ;;  %v3646_v17 = vld [vmem:[#allocation5 + $0x58c] ss:$16 sps:$4 sm:$0xff]   ;;  %v3704_v18 = vld [vmem:[#allocation7 + $0xf0] ss:$8 sps:$4 sm:$0xff]  }
 0x117   : > { %2462 = vmatpush1.bf16.msra.mxu0 %v3665_v19  ;;  %v3644_v19 = vld [vmem:[#allocation5 + $0x588] ss:$16 sps:$4 sm:$0xff]  }
 0x118   : > { %2463 = vmatprep.subr.bf16.mxu0 %v3670_v20  ;;  %v3652_v20 = vld [vmem:[#allocation5 + $0x5ac] ss:$16 sps:$4 sm:$0xff]  }
 0x119   : > { %1869 = vmatpush1.bf16.msra.mxu1 %v3593_v21  ;;  %v3650_v21 = vld [vmem:[#allocation5 + $0x5a8] ss:$16 sps:$4 sm:$0xff]  }
 0x11a   : > { %1870 = vmatprep.subr.bf16.mxu1 %v3598_v22  ;;  %v3655_v22 = vld [vmem:[#allocation5 + $0x5cc] ss:$16 sps:$4 sm:$0xff]  }
 0x11b   : > { %2464 = vmatpush1.bf16.msra.mxu0 %v3668_v23  ;;  %v3653_v23 = vld [vmem:[#allocation5 + $0x5c8] ss:$16 sps:$4 sm:$0xff]  }
 0x11c   : > { %2465 = vmatprep.subr.bf16.mxu0 %v3673_v24  ;;  %v3658_v24 = vld [vmem:[#allocation5 + $0x5ec] ss:$16 sps:$4 sm:$0xff]  }
 0x11d   : > { %1871 = vmatpush1.bf16.msra.mxu1 %v3596_v25  ;;  %v3709_v25 = vld [vmem:[#allocation7 + $0x104] ss:$8 sps:$4 sm:$0xff]  }
 0x11e   : > { %1872 = vmatprep.subr.bf16.mxu1 %v3601_v26  ;;  %v3656_v26 = vld [vmem:[#allocation5 + $0x5e8] ss:$16 sps:$4 sm:$0xff]  }
 0x11f   : > { %2466 = vmatpush1.bf16.msra.mxu0 %v3671_v27 }
 0x120   : > { %2467 = vmatprep.subr.bf16.mxu0 %v3676_v28 }
 0x121   : > { %1873 = vmatpush1.bf16.msra.mxu1 %v3599_v29 }
 0x122   : > { %1874 = vmatprep.subr.bf16.mxu1 %v3604_v30 }
 0x123   : > { %2468 = vmatpush1.bf16.msra.mxu0 %v3674_v31 }
 0x124   : > { %2469 = vmatprep.subr.bf16.mxu0 %v3679_v32 }
 0x125   : > { %1875 = vmatpush1.bf16.msra.mxu1 %v3602_v33 }
 0x126   : > { %1876 = vmatprep.subr.bf16.mxu1 %v3607_v34 }
 0x127   : > { %2470 = vmatpush1.bf16.msra.mxu0 %v3677_v35  ;;  %v574_v35 = vlaneseq }
 0x128   : > { %2471 = vmatprep.subr.bf16.mxu0 %v3682_v36 }
 0x129   : > { %1877 = vmatpush1.bf16.msra.mxu1 %v3605_v38  ;;  %v4208_v36 = vshrl.u32 %v574_v35, 7 }
 0x12a   : > { %1899 = vmatprep.subr.bf16.mxu1 %v3610_v39 }
 0x12b   : > { %2472 = vmatpush1.bf16.msra.mxu0 %v3680_v41  ;;  %v576_v38 = vsub.s32 0, %v4208_v36 }
 0x12c   : > { %2473 = vmatprep.subr.bf16.mxu0 %v3685_v42  ;;  %1879 = vmatmul.mubr.bf16.vlgmr.msra.gmra.mrb[8].mxu1 %v4144_v16  ;;  %v3617_v16 = vld [vmem:[#allocation5 + $0x468] ss:$16 sps:$4 sm:$0xff]  }
 0x12d   : > { %1900 = vmatpush1.bf16.msra.mxu1 %v3608_v45  ;;  %1888 = vmatprep.mubr.bf16.mxu1 %v4159_v48  ;;  %v3622_v48 = vld [vmem:[#allocation5 + $0x48c] ss:$16 sps:$4 sm:$0xff]  }
 0x12e   : > { %1901 = vmatprep.subr.bf16.mxu1 %v3613_v46 }
 0x12f   : > { %2474 = vmatpush1.bf16.msra.mxu0 %v3683_v47 }
 0x130   : > { %2475 = vmatprep.subr.bf16.mxu0 %v3688_v52 }
 0x131   : > { %1902 = vmatpush1.bf16.msra.mxu1 %v3611_v53 }
 0x132   : > { %1903 = vmatprep.subr.bf16.mxu1 %v3616_v13 }
 0x133   : > { %2476 = vmatpush1.bf16.msra.mxu0 %v3686_v54 }
 0x134   : > { %2477 = vmatprep.subr.bf16.mxu0 %v3691_v55  ;;  %1889 = vmatmul.mubr.bf16.gmra.mrb[12].mxu1 %v4163_v50  ;;  %v3628_v50 = vld [vmem:[#allocation5 + $0x4cc] ss:$16 sps:$4 sm:$0xff]  }
 0x135   : > { %1904 = vmatpush1.bf16.msra.mxu1 %v3614_v57  ;;  %1931 = vmatprep.mubr.bf16.mxu1 %v4171_v62  ;;  %v3626_v62 = vld [vmem:[#allocation5 + $0x4c8] ss:$16 sps:$4 sm:$0xff]  }
 0x136   : > { %1905 = vmatprep.subr.bf16.mxu1 %v3619_v58 }
 0x137   : > { %2478 = vmatpush1.bf16.msra.mxu0 %v3689_v43 }
 0x138   : > { %2479 = vmatprep.subr.bf16.mxu0 %v3694_v59 }
 0x139   : > { %1906 = vmatpush1.bf16.msra.mxu1 %v3617_v16 }
 0x13a   : > { %1907 = vmatprep.subr.bf16.mxu1 %v3622_v48 }
 0x13b   : > { %2480 = vmatpush1.bf16.msra.mxu0 %v3692_v60  ;;  %v3755_v60 = vld [vmem:[%s4330_s5 + $0x40] sm:$0xff]  }
 0x13c   : > { %2481 = vmatprep.subr.bf16.mxu0 %v3697_v61  ;;  %v3756_v61 = vld [vmem:[%s4330_s5] sm:$0xff]  }
 0x13d   : > { %1908 = vmatpush1.bf16.msra.mxu1 %v3620_v63  ;;  %v3757_v63 = vld [vmem:[%s4330_s5 + $0x48] sm:$0xff]  }
 0x13e   : > { %1909 = vmatprep.subr.bf16.mxu1 %v3625_v0 }
 0x13f   : > { %2482 = vmatpush1.bf16.msra.mxu0 %v3695_v1 }
 0x140   : > { %2483 = vmatprep.subr.bf16.mxu0 %v3700_v6 }
 0x141   : > { %1910 = vmatpush1.bf16.msra.mxu1 %v3623_v2 }
 0x142   : > { %1911 = vmatprep.subr.bf16.mxu1 %v3628_v50 }
 0x143   : > { %2484 = vmatpush1.bf16.msra.mxu0 %v3698_v8  ;;  %v3758_v8 = vld [vmem:[%s4330_s5 + $0x8] sm:$0xff]  }
 0x144   : > { %2485 = vmatprep.subr.bf16.mxu0 %v3703_v10 }
 0x145   : > { %1912 = vmatpush1.bf16.msra.mxu1 %v3626_v62 }
 0x146   : > { %1913 = vmatprep.subr.bf16.mxu1 %v3631_v44 }
 0x147   : > { %2486 = vmatpush1.bf16.msra.mxu0 %v3701_v12  ;;  %v3712_v12 = vld [vmem:[#allocation7 + $0x114] ss:$8 sps:$4 sm:$0xff]  }
 0x148   : > { %2487 = vmatprep.subr.bf16.mxu0 %v3706_v15 }
 0x149   : > { %1914 = vmatpush1.bf16.msra.mxu1 %v3629_v51 }
 0x14a   : > { %1915 = vmatprep.subr.bf16.mxu1 %v3634_v3 }
 0x14b   : > { %2488 = vmatpush1.bf16.msra.mxu0 %v3704_v18 }
 0x14c   : > { %2510 = vmatprep.subr.bf16.mxu0 %v3709_v25  ;;  %v3715_v25 = vld [vmem:[#allocation7 + $0x124] ss:$8 sps:$4 sm:$0xff]  }
 0x14d   : > { %1916 = vmatpush1.bf16.msra.mxu1 %v3632_v56 }
 0x14e   : > { %1917 = vmatprep.subr.bf16.mxu1 %v3637_v4 }
 0x151   : > { %1918 = vmatpush1.bf16.msra.mxu1 %v3635_v5 }
 0x152   : > { %1919 = vmatprep.subr.bf16.mxu1 %v3640_v7  ;;  %v3707_v7 = vld [vmem:[#allocation7 + $0x100] ss:$8 sps:$4 sm:$0xff]  }
 0x155   : > { %1920 = vmatpush1.bf16.msra.mxu1 %v3638_v9 }
 0x156   : > { %1921 = vmatprep.subr.bf16.mxu1 %v3643_v11 }
 0x159   : > { %1922 = vmatpush1.bf16.msra.mxu1 %v3641_v14  ;;  %v3759_v14 = vld [vmem:[%s4330_s5 + $0x50] sm:$0xff]  }
 0x15a   : > { %1923 = vmatprep.subr.bf16.mxu1 %v3646_v17 }
 0x15d   : > { %1924 = vmatpush1.bf16.msra.mxu1 %v3644_v19 }
 0x15e   : > { %1925 = vmatprep.subr.bf16.mxu1 %v3652_v20 }
 0x161   : > { %1926 = vmatpush1.bf16.msra.mxu1 %v3650_v21  ;;  %v3710_v21 = vld [vmem:[#allocation7 + $0x110] ss:$8 sps:$4 sm:$0xff]  }
 0x162   : > { %1927 = vmatprep.subr.bf16.mxu1 %v3655_v22 }
 0x165   : > { %1928 = vmatpush1.bf16.msra.mxu1 %v3653_v23  ;;  %v3760_v23 = vld [vmem:[%s4330_s5 + $0x10] sm:$0xff]  }
 0x166   : > { %1929 = vmatprep.subr.bf16.mxu1 %v3658_v24 }
 0x169   : > { %1930 = vmatpush1.bf16.msra.mxu1 %v3656_v26  ;;  %v3761_v26 = vld [vmem:[%s4330_s5 + $0x58] sm:$0xff]  }
 0x16a   : > { %3187 = vmatprep.subr.bf16.mxu1 %v3755_v60  ;;  %v3728_v60 = vld [vmem:[#allocation7 + $0x170] ss:$8 sps:$4 sm:$0xff]  }
 0x16c   : > { %1932 = vmatmul.mubr.bf16.vlgmr.msra.gmra.mrb[8].mxu1 %v4178_v37  ;;  %v4214_v37 = vld [vmem:[%s4327_s2] sm:$0xf] }
 0x16d   : > { %1941 = vmatprep.mubr.bf16.mxu1 %v4180_v40  ;;  %v580_v40 = vsub.s32 1, %v4208_v36  ;;  %3188 = vmatpush3.bf16.msra.mxu1 %v3756_v61  ;;  %v3733_v61 = vld [vmem:[#allocation7 + $0x184] ss:$8 sps:$4 sm:$0xff]  }
 0x16e   : > { %3189 = vmatprep.subr.bf16.mxu1 %v3757_v63  ;;  %v3731_v63 = vld [vmem:[#allocation7 + $0x180] ss:$8 sps:$4 sm:$0xff]  }
 0x16f   : > { %v581_v39 = vrot.slane %v4214_v37, %v580_v40 }
 0x171   : > { %3190 = vmatpush3.bf16.msra.mxu1 %v3758_v8  ;;  %v3752_v8 = vld [vmem:[#allocation7 + $0x1f0] ss:$8 sps:$4 sm:$0xff]  }
 0x172   : > { %3191 = vmatprep.subr.bf16.mxu1 %v3759_v14 }
 0x174   : > { %1942 = vmatmul.mubr.bf16.gmra.mrb[12].mxu1 %v4188_v49  ;;  %v577_v49 = vrot.slane %v4214_v37, %v576_v38 }
 0x175   : > { %3192 = vmatpush3.bf16.msra.mxu1 %v3760_v23 }
 0x176   : > { %3193 = vmatprep.subr.bf16.mxu1 %v3761_v26 }
 0x17f   : > { %v1615_v27 = vpop.f32.mrb[0].mxu1 }
 0x180   : > { %v1617_v28 = vpop.f32.mrb[1].mxu1  ;;  %v1616_v41 = vadd.f32 %v1615_v27, %v577_v49 }
 0x181   : > { %v1619_v29 = vpop.f32.mrb[2].mxu1  ;;  %v1618_v42 = vadd.f32 %v1617_v28, %v581_v39 }
 0x182   : > { %v1621_v30 = vpop.f32.mrb[3].mxu1  ;;  %v1620_v46 = vadd.f32 %v1619_v29, %v577_v49 }
 0x183   : > { %v1622_v53 = vadd.f32 %v1621_v30, %v581_v39 }
 0x187   : > { %v1625_v31 = vpop.f32.mrb[4].mxu1 }
 0x188   : > { %v1627_v32 = vpop.f32.mrb[5].mxu1  ;;  %v1626_v0 = vadd.f32 %v1625_v31, %v577_v49 }
 0x189   : > { %v1629_v33 = vpop.f32.mrb[6].mxu1  ;;  %v1628_v50 = vadd.f32 %v1627_v32, %v581_v39 }
 0x18a   : > { %v1631_v34 = vpop.f32.mrb[7].mxu1  ;;  %v1630_v56 = vadd.f32 %v1629_v33, %v577_v49  ;;  %v3762_v49 = vld [vmem:[%s4330_s5 + $0x18] sm:$0xff]  }
 0x18b   : > { %v1632_v9 = vadd.f32 %v1631_v34, %v581_v39  ;;  %v3713_v34 = vld [vmem:[#allocation7 + $0x120] ss:$8 sps:$4 sm:$0xff]   ;;  %v3718_v39 = vld [vmem:[#allocation7 + $0x134] ss:$8 sps:$4 sm:$0xff]   ;;  %3194 = vmatpush3.bf16.msra.mxu1 %v3762_v49 }
 0x1d0   : > { %v1774_v45 = vpop.f32.mrb[0].mxu0 }
 0x1d1   : > { %v3216_v47 = vadd.f32 %v1774_v45, %v1616_v41  ;;  %v1776_v52 = vpop.f32.mrb[1].mxu0 }
 0x1d2   : > { %v3218_v13 = vadd.f32 %v1776_v52, %v1618_v42  ;;  %v1778_v54 = vpop.f32.mrb[2].mxu0  ;;  %v3763_v42 = vld [vmem:[%s4330_s5 + $0x60] sm:$0xff]  }
 0x1d3   : > { %v2021_v55 = vmul.f32 0.2, %v3216_v47  ;;  %v3220_v57 = vadd.f32 %v1778_v54, %v1620_v46  ;;  %v1780_v58 = vpop.f32.mrb[3].mxu0  ;;  %vm2005_vm1 = vcmp.gt.f32.partialorder %v3216_v47, 0.0  ;;  %v3716_v46 = vld [vmem:[#allocation7 + $0x130] ss:$8 sps:$4 sm:$0xff]   ;;  %3195 = vmatprep.subr.bf16.mxu1 %v3763_v42 }
 0x1d4   : > { %v2022_v43 = vmul.f32 0.2, %v3218_v13  ;;  %v3222_v59 = vadd.f32 %v1780_v58, %v1622_v53  ;;  %vm2006_vm2 = vcmp.gt.f32.partialorder %v3218_v13, 0.0  ;;  %v3721_v52 = vld [vmem:[#allocation7 + $0x144] ss:$8 sps:$4 sm:$0xff]  }
 0x1d5   : > { %vm2009_vm3 = vcmp.gt.f32.partialorder %v3220_v57, 0.0  ;;  %v2025_v16 = vmul.f32 0.2, %v3220_v57  ;;  %v2037_v1 = vsel %vm2005_vm1, %v3216_v47, %v2021_v55  ;;  %v3764_v47 = vld [vmem:[%s4330_s5 + $0x20] sm:$0xff]  }
 0x1d6   : > { %vm2010_vm4 = vcmp.gt.f32.partialorder %v3222_v59, 0.0  ;;  %v2026_v48 = vmul.f32 0.2, %v3222_v59  ;;  %v2038_v51 = vsel %vm2006_vm2, %v3218_v13, %v2022_v43  ;;  %v3719_v13 = vld [vmem:[#allocation7 + $0x140] ss:$8 sps:$4 sm:$0xff]   ;;  %3196 = vmatpush3.bf16.msra.mxu1 %v3764_v47 }
 0x1d7   : > { %v2041_v2 = vsel %vm2009_vm3, %v3220_v57, %v2025_v16  ;;  %v3724_v55 = vld [vmem:[#allocation7 + $0x154] ss:$8 sps:$4 sm:$0xff]   ;;  %v3722_v43 = vld [vmem:[#allocation7 + $0x150] ss:$8 sps:$4 sm:$0xff]   ;;  %v3725_v16 = vld [vmem:[#allocation7 + $0x160] ss:$8 sps:$4 sm:$0xff]  }
 0x1d8   : > { %v2053_v62 = vpack.c.bf16 %v2041_v2, %v2037_v1  ;;  %v1784_v44 = vpop.f32.mrb[4].mxu0  ;;  %v2042_v3 = vsel %vm2010_vm4, %v3222_v59, %v2026_v48  ;;  %v3727_v59 = vld [vmem:[#allocation7 + $0x164] ss:$8 sps:$4 sm:$0xff]   ;;  %v3730_v48 = vld [vmem:[#allocation7 + $0x174] ss:$8 sps:$4 sm:$0xff]  }
 0x1d9   : > { %v3224_v4 = vadd.f32 %v1784_v44, %v1626_v0  ;;  %v1786_v5 = vpop.f32.mrb[5].mxu0  ;;  %v2054_v6 = vpack.c.bf16 %v2042_v3, %v2038_v51  ;;  %v3736_v0 = vld [vmem:[#allocation7 + $0x194] ss:$8 sps:$4 sm:$0xff]   ;;  %v3734_v1 = vld [vmem:[#allocation7 + $0x190] ss:$8 sps:$4 sm:$0xff]  }
 0x1da   : > { %v3226_v10 = vadd.f32 %v1786_v5, %v1628_v50  ;;  %v1788_v11 = vpop.f32.mrb[6].mxu0  ;;  %v3739_v2 = vld [vmem:[#allocation7 + $0x1a4] ss:$8 sps:$4 sm:$0xff]   ;;  %v3737_v50 = vld [vmem:[#allocation7 + $0x1a0] ss:$8 sps:$4 sm:$0xff]  }
 0x1db   : > { %v2029_v15 = vmul.f32 0.2, %v3224_v4  ;;  %v3228_v17 = vadd.f32 %v1788_v11, %v1630_v56  ;;  %v1790_v18 = vpop.f32.mrb[7].mxu0  ;;  %2489 = vmatprep.mubr.bf16.mxu0 %v2054_v6  ;;  %vm2013_vm5 = vcmp.gt.f32.partialorder %v3224_v4, 0.0  ;;  %v3740_v44 = vld [vmem:[#allocation7 + $0x1b0] ss:$8 sps:$4 sm:$0xff]  }
 0x1dc   : > { %v2030_v19 = vmul.f32 0.2, %v3226_v10  ;;  %v3230_v20 = vadd.f32 %v1790_v18, %v1632_v9  ;;  %2490 = vmatmul.mubr.bf16.vlgmr.msra.gmra.mrb[16].mxu0 %v2053_v62  ;;  %vm2014_vm6 = vcmp.gt.f32.partialorder %v3226_v10, 0.0  ;;  %v3742_v62 = vld [vmem:[#allocation7 + $0x1b4] ss:$8 sps:$4 sm:$0xff]   ;;  %v584_v9 = vsub.s32 2, %v4208_v36 }
 0x1dd   : > { %vm2017_vm7 = vcmp.gt.f32.partialorder %v3228_v17, 0.0  ;;  %v2033_v22 = vmul.f32 0.2, %v3228_v17  ;;  %2511 = vmatpush1.bf16.msra.mxu0 %v3707_v7  ;;  %v2045_v27 = vsel %vm2013_vm5, %v3224_v4, %v2029_v15  ;;  %v3745_v51 = vld [vmem:[#allocation7 + $0x1c4] ss:$8 sps:$4 sm:$0xff]  }
 0x1de   : > { %vm2018_vm8 = vcmp.gt.f32.partialorder %v3230_v20, 0.0  ;;  %v2034_v24 = vmul.f32 0.2, %v3230_v20  ;;  %2512 = vmatprep.subr.bf16.mxu0 %v3712_v12  ;;  %v2046_v29 = vsel %vm2014_vm6, %v3226_v10, %v2030_v19  ;;  %v3743_v3 = vld [vmem:[#allocation7 + $0x1c0] ss:$8 sps:$4 sm:$0xff]   ;;  %v588_v10 = vsub.s32 3, %v4208_v36 }
 0x1df   : > { %v2049_v28 = vsel %vm2017_vm7, %v3228_v17, %v2033_v22  ;;  %v3748_v56 = vld [vmem:[#allocation7 + $0x1d4] ss:$8 sps:$4 sm:$0xff]   ;;  %v3746_v4 = vld [vmem:[#allocation7 + $0x1d0] ss:$8 sps:$4 sm:$0xff]   ;;  %v3751_v5 = vld [vmem:[#allocation7 + $0x1e4] ss:$8 sps:$4 sm:$0xff]   ;;  %v585_v11 = vrot.slane %v4214_v37, %v584_v9 }
 0x1e0   : > { %v2050_v30 = vsel %vm2018_vm8, %v3230_v20, %v2034_v24  ;;  %v2057_v31 = vpack.c.bf16 %v2049_v28, %v2045_v27  ;;  %v4245_v32 = vpop.f32.mrb[8].mxu0  ;;  %v3749_v6 = vld [vmem:[#allocation7 + $0x1e0] ss:$8 sps:$4 sm:$0xff]   ;;  %v3754_v7 = vld [vmem:[#allocation7 + $0x1f4] ss:$8 sps:$4 sm:$0xff]   ;;  %v589_v12 = vrot.slane %v4214_v37, %v588_v10 }
 0x1e1   : > { %v2058_v33 = vpack.c.bf16 %v2050_v30, %v2046_v29  ;;  %2513 = vmatpush1.bf16.msra.mxu0 %v3710_v21  ;;  %v4247_v35 = vpop.f32.mrb[9].mxu0 }
 0x1e2   : > { %2514 = vmatprep.subr.bf16.mxu0 %v3715_v25  ;;  %v4252_v41 = vpop.f32.mrb[10].mxu0 }
 0x1e3   : > { %2499 = vmatprep.mubr.bf16.mxu0 %v2058_v33  ;;  %v4257_v45 = vpop.f32.mrb[11].mxu0 }
 0x1e4   : > { %2500 = vmatmul.mubr.bf16.gmra.mrb[20].mxu0 %v2057_v31 }
 0x1e5   : > { %2515 = vmatpush1.bf16.msra.mxu0 %v3713_v34 }
 0x1e6   : > { %2516 = vmatprep.subr.bf16.mxu0 %v3718_v39 }
 0x1e8   : > { %v4262_v53 = vpop.f32.mrb[12].mxu0 }
 0x1e9   : > { %2517 = vmatpush1.bf16.msra.mxu0 %v3716_v46  ;;  %v4264_v54 = vpop.f32.mrb[13].mxu0 }
 0x1ea   : > { %2518 = vmatprep.subr.bf16.mxu0 %v3721_v52  ;;  %v4266_v57 = vpop.f32.mrb[14].mxu0 }
 0x1eb   : > { %v4268_v58 = vpop.f32.mrb[15].mxu0 }
 0x1ed   : > { %2519 = vmatpush1.bf16.msra.mxu0 %v3719_v13 }
 0x1ee   : > { %2520 = vmatprep.subr.bf16.mxu0 %v3724_v55 }
 0x1f1   : > { %2521 = vmatpush1.bf16.msra.mxu0 %v3722_v43 }
 0x1f2   : > { %2522 = vmatprep.subr.bf16.mxu0 %v3727_v59 }
 0x1f5   : > { %2523 = vmatpush1.bf16.msra.mxu0 %v3725_v16 }
 0x1f6   : > { %2524 = vmatprep.subr.bf16.mxu0 %v3730_v48 }
 0x1f9   : > { %2525 = vmatpush1.bf16.msra.mxu0 %v3728_v60 }
 0x1fa   : > { %2526 = vmatprep.subr.bf16.mxu0 %v3733_v61 }
 0x1fd   : > { %2527 = vmatpush1.bf16.msra.mxu0 %v3731_v63 }
 0x1fe   : > { %2528 = vmatprep.subr.bf16.mxu0 %v3736_v0 }
 0x201   : > { %2529 = vmatpush1.bf16.msra.mxu0 %v3734_v1 }
 0x202   : > { %2530 = vmatprep.subr.bf16.mxu0 %v3739_v2 }
 0x205   : > { %2531 = vmatpush1.bf16.msra.mxu0 %v3737_v50  ;;  %v3767_v50 = vld [vmem:[%s4330_s5 + $0x70] sm:$0xff]  }
 0x206   : > { %2532 = vmatprep.subr.bf16.mxu0 %v3742_v62  ;;  %v3768_v62 = vld [vmem:[%s4330_s5 + $0x30] sm:$0xff]  }
 0x209   : > { %2533 = vmatpush1.bf16.msra.mxu0 %v3740_v44  ;;  %v3769_v44 = vld [vmem:[%s4330_s5 + $0x78] sm:$0xff]  }
 0x20a   : > { %2534 = vmatprep.subr.bf16.mxu0 %v3745_v51  ;;  %v3770_v51 = vld [vmem:[%s4330_s5 + $0x38] sm:$0xff]  }
 0x20d   : > { %2535 = vmatpush1.bf16.msra.mxu0 %v3743_v3  ;;  %v2125_v3 = vld [vmem:[%s4329_s4] sm:$0x3] }
 0x20e   : > { %2536 = vmatprep.subr.bf16.mxu0 %v3748_v56  ;;  %v2130_v56 = vrot.slane %v2125_v3, %v576_v38 }
 0x211   : > { %2537 = vmatpush1.bf16.msra.mxu0 %v3746_v4  ;;  %v2134_v4 = vrot.slane %v2125_v3, %v580_v40 }
 0x212   : > { %2538 = vmatprep.subr.bf16.mxu0 %v3751_v5 }
 0x215   : > { %2539 = vmatpush1.bf16.msra.mxu0 %v3749_v6 }
 0x216   : > { %2540 = vmatprep.subr.bf16.mxu0 %v3754_v7 }
 0x219   : > { %2541 = vmatpush1.bf16.msra.mxu0 %v3752_v8 }
 0x23f   : > { %v1933_v14 = vpop.f32.mrb[8].mxu1 }
 0x240   : > { %v3231_v15 = vadd.f32 %v1933_v14, %v585_v11  ;;  %v1935_v17 = vpop.f32.mrb[9].mxu1 }
 0x241   : > { %v3233_v18 = vadd.f32 %v1935_v17, %v589_v12  ;;  %v1937_v19 = vpop.f32.mrb[10].mxu1 }
 0x242   : > { %v3232_v20 = vadd.f32 %v3231_v15, %v4245_v32  ;;  %v3235_v21 = vadd.f32 %v1937_v19, %v585_v11  ;;  %v1939_v22 = vpop.f32.mrb[11].mxu1 }
 0x243   : > { %v3234_v23 = vadd.f32 %v3233_v18, %v4247_v35  ;;  %v3237_v24 = vadd.f32 %v1939_v22, %v589_v12 }
 0x244   : > { %v2023_v25 = vmul.f32 0.2, %v3232_v20  ;;  %v3236_v26 = vadd.f32 %v3235_v21, %v4252_v41  ;;  %vm2007_vm9 = vcmp.gt.f32.partialorder %v3232_v20, 0.0 }
 0x245   : > { %v2024_v27 = vmul.f32 0.2, %v3234_v23  ;;  %v3238_v28 = vadd.f32 %v3237_v24, %v4257_v45  ;;  %vm2008_vm10 = vcmp.gt.f32.partialorder %v3234_v23, 0.0 }
 0x246   : > { %vm2011_vm11 = vcmp.gt.f32.partialorder %v3236_v26, 0.0  ;;  %v2027_v37 = vmul.f32 0.2, %v3236_v26  ;;  %v2039_v31 = vsel %vm2007_vm9, %v3232_v20, %v2023_v25  ;;  %vm2799_vm9 = vcmask 7168  }
 0x247   : > { %vm2012_vm12 = vcmp.gt.f32.partialorder %v3238_v28, 0.0  ;;  %v2028_v29 = vmul.f32 0.2, %v3238_v28  ;;  %v1943_v30 = vpop.f32.mrb[12].mxu1  ;;  %v2040_v42 = vsel %vm2008_vm10, %v3234_v23, %v2024_v27 }
 0x248   : > { %v2043_v32 = vsel %vm2011_vm11, %v3236_v26, %v2027_v37  ;;  %v3239_v33 = vadd.f32 %v1943_v30, %v585_v11  ;;  %v1945_v34 = vpop.f32.mrb[13].mxu1 }
 0x249   : > { %v2055_v49 = vpack.c.bf16 %v2043_v32, %v2039_v31  ;;  %v3241_v35 = vadd.f32 %v1945_v34, %v589_v12  ;;  %v1947_v39 = vpop.f32.mrb[14].mxu1  ;;  %v2044_v46 = vsel %vm2012_vm12, %v3238_v28, %v2028_v29 }
 0x24a   : > { %v3240_v41 = vadd.f32 %v3239_v33, %v4262_v53  ;;  %v3243_v47 = vadd.f32 %v1947_v39, %v585_v11  ;;  %v1949_v52 = vpop.f32.mrb[15].mxu1  ;;  %v2056_v45 = vpack.c.bf16 %v2044_v46, %v2040_v42 }
 0x24b   : > { %v3242_v13 = vadd.f32 %v3241_v35, %v4264_v54  ;;  %v3245_v55 = vadd.f32 %v1949_v52, %v589_v12 }
 0x24c   : > { %v2031_v43 = vmul.f32 0.2, %v3240_v41  ;;  %v3244_v59 = vadd.f32 %v3243_v47, %v4266_v57  ;;  %2542 = vmatprep.mubr.bf16.mxu0 %v2056_v45  ;;  %vm2015_vm13 = vcmp.gt.f32.partialorder %v3240_v41, 0.0  ;;  %v3765_v57 = vld [vmem:[%s4330_s5 + $0x68] sm:$0xff]  }
 0x24d   : > { %v2032_v16 = vmul.f32 0.2, %v3242_v13  ;;  %v3246_v48 = vadd.f32 %v3245_v55, %v4268_v58  ;;  %2543 = vmatmul.mubr.bf16.vlgmr.msra.gmra.mrb[16].mxu0 %v2055_v49  ;;  %vm2016_vm14 = vcmp.gt.f32.partialorder %v3242_v13, 0.0  ;;  %v3766_v58 = vld [vmem:[%s4330_s5 + $0x28] sm:$0xff]   ;;  %3197 = vmatprep.subr.bf16.mxu1 %v3765_v57 }
 0x24e   : > { %vm2019_vm15 = vcmp.gt.f32.partialorder %v3244_v59, 0.0  ;;  %v2035_v60 = vmul.f32 0.2, %v3244_v59  ;;  %v2047_v61 = vsel %vm2015_vm13, %v3240_v41, %v2031_v43  ;;  %3198 = vmatpush3.bf16.msra.mxu1 %v3766_v58  ;;  %v3168_v41 = vld [vmem:[#allocation2] ss:$0 sm:$0xff] }
 0x24f   : > { %vm2020_vm0 = vcmp.gt.f32.partialorder %v3246_v48, 0.0  ;;  %v2036_v53 = vmul.f32 0.2, %v3246_v48  ;;  %v2048_v0 = vsel %vm2016_vm14, %v3242_v13, %v2032_v16  ;;  %3199 = vmatprep.subr.bf16.mxu1 %v3767_v50 }
 0x250   : > { %v2051_v63 = vsel %vm2019_vm15, %v3244_v59, %v2035_v60 }
 0x251   : > { %v2052_v1 = vsel %vm2020_vm0, %v3246_v48, %v2036_v53  ;;  %v2059_v54 = vpack.c.bf16 %v2051_v63, %v2047_v61 }
 0x252   : > { %v2060_v2 = vpack.c.bf16 %v2052_v1, %v2048_v0  ;;  %3200 = vmatpush3.bf16.msra.mxu1 %v3768_v62 }
 0x253   : > { %3201 = vmatprep.subr.bf16.mxu1 %v3769_v44 }
 0x254   : > { %2552 = vmatprep.mubr.bf16.mxu0 %v2060_v2 }
 0x255   : > { %2553 = vmatmul.mubr.bf16.gmra.mrb[20].mxu0 %v2059_v54 }
 0x256   : > { %3202 = vmatpush3.bf16.msra.mxu1 %v3770_v51 }
 0x320   : > { %v2544_v5 = vpop.f32.mrb[16].mxu0 }
 0x321   : > { %v3247_v6 = vadd.f32 %v2544_v5, %v2130_v56  ;;  %v2546_v7 = vpop.f32.mrb[17].mxu0 }
 0x322   : > { %v3248_v8 = vadd.f32 %v2546_v7, %v2134_v4  ;;  %v2548_v9 = vpop.f32.mrb[18].mxu0 }
 0x323   : > { %v2571_v10 = vmul.f32 0.2, %v3247_v6  ;;  %v3249_v11 = vadd.f32 %v2548_v9, %v2130_v56  ;;  %v2550_v12 = vpop.f32.mrb[19].mxu0  ;;  %vm2563_vm1 = vcmp.gt.f32.partialorder %v3247_v6, 0.0 }
 0x324   : > { %v2572_v14 = vmul.f32 0.2, %v3248_v8  ;;  %v3250_v15 = vadd.f32 %v2550_v12, %v2134_v4  ;;  %vm2564_vm2 = vcmp.gt.f32.partialorder %v3248_v8, 0.0 }
 0x325   : > { %vm2565_vm3 = vcmp.gt.f32.partialorder %v3249_v11, 0.0  ;;  %v2573_v17 = vmul.f32 0.2, %v3249_v11  ;;  %v2579_v38 = vsel %vm2563_vm1, %v3247_v6, %v2571_v10 }
 0x326   : > { %vm2566_vm4 = vcmp.gt.f32.partialorder %v3250_v15, 0.0  ;;  %v2574_v18 = vmul.f32 0.2, %v3250_v15  ;;  %v2580_v20 = vsel %vm2564_vm2, %v3248_v8, %v2572_v14 }
 0x327   : > { %v2581_v19 = vsel %vm2565_vm3, %v3249_v11, %v2573_v17 }
 0x328   : > { %v2587_v36 = vpack.c.bf16 %v2581_v19, %v2579_v38  ;;  %v2554_v40 = vpop.f32.mrb[20].mxu0  ;;  %v2582_v21 = vsel %vm2566_vm4, %v3250_v15, %v2574_v18 }
 0x329   : > { %v3251_v22 = vadd.f32 %v2554_v40, %v2130_v56  ;;  %v2556_v23 = vpop.f32.mrb[21].mxu0  ;;  %v2588_v24 = vpack.c.bf16 %v2582_v21, %v2580_v20 }
 0x32a   : > { %v3252_v25 = vadd.f32 %v2556_v23, %v2134_v4  ;;  %v2558_v26 = vpop.f32.mrb[22].mxu0 }
 0x32b   : > { %v2575_v27 = vmul.f32 0.2, %v3251_v22  ;;  %v3253_v28 = vadd.f32 %v2558_v26, %v2130_v56  ;;  %v2560_v37 = vpop.f32.mrb[23].mxu0  ;;  %2758 = vmatprep.mubr.bf16.mxu1 %v2588_v24  ;;  %vm2567_vm5 = vcmp.gt.f32.partialorder %v3251_v22, 0.0 }
 0x32c   : > { %v2576_v29 = vmul.f32 0.2, %v3252_v25  ;;  %v3254_v30 = vadd.f32 %v2560_v37, %v2134_v4  ;;  %2759 = vmatmul.mubr.bf16.vlgmr.msra.gmra.mrb[16].mxu1 %v2587_v36  ;;  %vm2568_vm6 = vcmp.gt.f32.partialorder %v3252_v25, 0.0 }
 0x32d   : > { %vm2569_vm7 = vcmp.gt.f32.partialorder %v3253_v28, 0.0  ;;  %v2577_v31 = vmul.f32 0.2, %v3253_v28  ;;  %v2583_v33 = vsel %vm2567_vm5, %v3251_v22, %v2575_v27 }
 0x32e   : > { %vm2570_vm8 = vcmp.gt.f32.partialorder %v3254_v30, 0.0  ;;  %v2578_v32 = vmul.f32 0.2, %v3254_v30  ;;  %v2584_v49 = vsel %vm2568_vm6, %v3252_v25, %v2576_v29 }
 0x32f   : > { %v2585_v34 = vsel %vm2569_vm7, %v3253_v28, %v2577_v31 }
 0x330   : > { %v2586_v35 = vsel %vm2570_vm8, %v3254_v30, %v2578_v32  ;;  %v2589_v39 = vpack.c.bf16 %v2585_v34, %v2583_v33 }
 0x331   : > { %v2590_v42 = vpack.c.bf16 %v2586_v35, %v2584_v49 }
 0x333   : > { %2766 = vmatprep.mubr.bf16.mxu1 %v2590_v42 }
 0x334   : > { %2767 = vmatmul.mubr.bf16.gmra.mrb[20].mxu1 %v2589_v39 }
 0x3ff   : > { %v3203_v46 = vpop.f32.mrb[16].mxu1 }
 0x400   : > { %v3204_v47 = vpop.f32.mrb[17].mxu1 }
 0x401   : > { %v3205_v52 = vadd.f32 %v3204_v47, %v3203_v46  ;;  %v3206_v45 = vpop.f32.mrb[18].mxu1 }
 0x402   : > { %v3207_v13 = vpop.f32.mrb[19].mxu1 }
 0x403   : > { %v2761_v55 = vadd.f32 %v3205_v52, %v3168_v41  ;;  %v3208_v43 = vadd.f32 %v3207_v13, %v3206_v45 }
 0x405   : > { %v2775_v59 = vsub.f32 0.0, %v2761_v55  ;;  %v2764_v16 = vadd.f32 %v3208_v43, %v3168_v41 }
 0x407   : > { %v2779_v48 = vmul.f32 1.442695, %v2775_v59  ;;  %v2776_v60 = vsub.f32 0.0, %v2764_v16  ;;  %v3209_v53 = vpop.f32.mrb[20].mxu1 }
 0x408   : > { %v3210_v61 = vpop.f32.mrb[21].mxu1 }
 0x409   : > { %3771 = vpow2.f32 %v2779_v48  ;;  %v2781_v63 = vmul.f32 1.442695, %v2776_v60  ;;  %v3211_v0 = vadd.f32 %v3210_v61, %v3209_v53  ;;  %v3212_v1 = vpop.f32.mrb[22].mxu1 }
 0x40a   : > { %v3213_v54 = vpop.f32.mrb[23].mxu1 }
 0x40b   : > { %3773 = vpow2.f32 %v2781_v63  ;;  %v2769_v2 = vadd.f32 %v3211_v0, %v3168_v41  ;;  %v3214_v57 = vadd.f32 %v3213_v54, %v3212_v1 }
 0x40d   : > { %v2777_v58 = vsub.f32 0.0, %v2769_v2  ;;  %v2772_v50 = vadd.f32 %v3214_v57, %v3168_v41 }
 0x40f   : > { %v2783_v62 = vmul.f32 1.442695, %v2777_v58  ;;  %v2778_v44 = vsub.f32 0.0, %v2772_v50 }
 0x411   : > { %3775 = vpow2.f32 %v2783_v62  ;;  %v2785_v51 = vmul.f32 1.442695, %v2778_v44 }
 0x413   : > { %v3772_v3 = vpop.eup %3771  ;;  %3777 = vpow2.f32 %v2785_v51 }
 0x414   : > { %v2787_v56 = vadd.f32 1.0, %v3772_v3 }
 0x415   : > { %v3774_v4 = vpop.eup %3773 }
 0x416   : > { %3779 = vrcp.f32 %v2787_v56  ;;  %v2788_v5 = vadd.f32 1.0, %v3774_v4 }
 0x418   : > { %3781 = vrcp.f32 %v2788_v5 }
 0x41b   : > { %v3776_v6 = vpop.eup %3775 }
 0x41c   : > { %v2789_v7 = vadd.f32 1.0, %v3776_v6 }
 0x41d   : > { %v3778_v8 = vpop.eup %3777 }
 0x41e   : > { %3783 = vrcp.f32 %v2789_v7  ;;  %v2790_v9 = vadd.f32 1.0, %v3778_v8 }
 0x420   : > { %v3780_v10 = vpop.eup %3779  ;;  %3785 = vrcp.f32 %v2790_v9 }
 0x421   : > { %2800 = vst.msk [vmem:[%s331_s29] sm:$0xff] %vm2799_vm9, %v3780_v10 }
 0x422   : > { %v3782_v11 = vpop.eup %3781 }
 0x423   : > { %2801 = vst.msk [vmem:[%s331_s29 + $0x8] sm:$0xff] %vm2799_vm9, %v3782_v11 }
 0x428   : > { %v3784_v12 = vpop.eup %3783 }
 0x429   : > { %2802 = vst.msk [vmem:[%s331_s29 + $0x10] sm:$0xff] %vm2799_vm9, %v3784_v12 }
 0x42a   : > { %v3786_v14 = vpop.eup %3785 }
 0x42b   : > { %2803 = vst.msk [vmem:[%s331_s29 + $0x18] sm:$0xff] %vm2799_vm9, %v3786_v14 }
 0x42c PF: > { %p20_p6 = scmp.ge.s32.totalorder %s4062_s24, 4   ;;  %s4345_s26 = smov %s3903_s27 }
 0x42d   : > { %s4346_s27 = smov %s3907_s28  ;;  %s4347_s28 = smov %s4071_s10 }
 0x42e   : > { %s4348_s29 = smov %s4062_s24  ;;  %22 = sbr.rel (!%p20_p6) target bundleno = 7 (0x7), region = 96 }
 0x435   :  { %2826 = vsyncpa [#allocation4], 1 }
 0x436   :  { %2828 = vsyncpa [#allocation4 + $0x1], 1 }
 0x437   :  { %2829 = vsyncpa [#allocation6], 1 }

</bundles_post_ra>
